<compile_context>
chip_gen: v7x
topology: tpu7x:2x2x1
jax: 0.10.0
libtpu: 0.0.40
codegen_flags: <defaults>
</compile_context>

<pallas_src>
import functools

import jax
import jax.numpy as jnp
from jax import lax
from jax.experimental import pallas as pl
from jax.experimental.pallas import tpu as pltpu


def _round_up(x, m):
    return ((x + m - 1) // m) * m


# ---------------------------------------------------------------------------
# Kernel A: hoisted input-side gate matmul (fully parallel over time chunks).
#   gates_x = x @ W_ih + (b_ih + b_hh)
# ---------------------------------------------------------------------------
def _input_gates_kernel(x_ref, wih_ref, b_ref, o_ref):
    tt, bp, e = x_ref.shape
    g = o_ref.shape[-1]
    x2 = x_ref[...].reshape(tt * bp, e)          # merge (TT, B_pad) -> big M
    y = jnp.dot(x2.astype(wih_ref.dtype), wih_ref[...],
                preferred_element_type=jnp.float32) + b_ref[...]
    o_ref[...] = y.reshape(tt, bp, g).astype(o_ref.dtype)


# ---------------------------------------------------------------------------
# Kernel B: serial LSTM recurrence, TT timesteps per grid step.
#   Per step only: gates = gates_x[t] + h @ W_hh ; nonlinearities ; state update.
# ---------------------------------------------------------------------------
def _lstm_recurrence_kernel(gx_ref, whh_ref, hseq_ref, h_ref, c_ref, *,
                            chunk, hidden_pad):
    t = pl.program_id(0)

    @pl.when(t == 0)
    def _():
        h_ref[...] = jnp.zeros_like(h_ref)
        c_ref[...] = jnp.zeros_like(c_ref)

    H = hidden_pad  # multiple of 128 -> lane-aligned gate slices

    def step(s, carry):
        gx = gx_ref[s]                                        # (B_pad, 4*H_pad)
        gates = gx + jnp.dot(h_ref[...].astype(whh_ref.dtype), whh_ref[...],
                             preferred_element_type=jnp.float32)
        i_g = jax.nn.sigmoid(gates[:, 0 * H:1 * H])
        f_g = jax.nn.sigmoid(gates[:, 1 * H:2 * H])
        g_g = jnp.tanh(gates[:, 2 * H:3 * H])
        o_g = jax.nn.sigmoid(gates[:, 3 * H:4 * H])
        c_new = f_g * c_ref[...] + i_g * g_g
        h_new = o_g * jnp.tanh(c_new)
        c_ref[...] = c_new
        h_ref[...] = h_new
        hseq_ref[s] = h_new
        return carry

    lax.fori_loop(0, chunk, step, 0, unroll=True)


# ---------------------------------------------------------------------------
# Kernel C: hoisted output projection (fully parallel over time chunks).
#   Consumes batch-first h, writes batch-first logits (no final transpose).
# ---------------------------------------------------------------------------
def _fc_kernel(h_ref, wfc_ref, bfc_ref, o_ref):
    bp, tt, hp = h_ref.shape
    vp = o_ref.shape[-1]
    h2 = h_ref[...].reshape(bp * tt, hp)         # merge (B_pad, TT) -> big M
    y = jnp.dot(h2.astype(wfc_ref.dtype), wfc_ref[...],
                preferred_element_type=jnp.float32) + bfc_ref[...]
    o_ref[...] = y.reshape(bp, tt, vp).astype(o_ref.dtype)


def type_predictor_forward(token_ids, params, *, time_chunk=8,
                           matmul_dtype=jnp.float32):
    """token_ids: (B, T) int32.  Returns logits (B, T, V) float32.

    matmul_dtype=jnp.bfloat16 is the fast path on v6e/v7x (f32 accumulation,
    f32 gate/state math is kept either way).  Default f32 matches PyTorch.
    """
    emb_table = params["embedding"]        # (V, E)
    w_ih = params["w_ih"]                  # (E, 4H)
    w_hh = params["w_hh"]                  # (H, 4H)
    b = params["b"]                        # (1, 4H)  = b_ih + b_hh
    w_fc = params["w_fc"]                  # (H, V)
    b_fc = params["b_fc"]                  # (1, V)

    B, T = token_ids.shape
    V, E = emb_table.shape
    H = w_hh.shape[0]

    f32 = jnp.float32
    B_pad = _round_up(B, 8)
    H_pad = _round_up(H, 128)
    V_pad = _round_up(V, 128)
    TT = time_chunk
    T_pad = _round_up(T, TT)
    n_chunks = T_pad // TT
    G_pad = 4 * H_pad

    # ---- pad parameters per-gate so every gate slice is lane-aligned and the
    #      padded hidden units stay exactly 0 (padded bias is 0). ----
    def pad_gate_cols(w):          # (rows, 4H) -> (rows, 4*H_pad)
        out = jnp.zeros((w.shape[0], G_pad), f32)
        for k in range(4):
            out = out.at[:, k * H_pad:k * H_pad + H].set(w[:, k * H:(k + 1) * H])
        return out

    w_ih_p = pad_gate_cols(w_ih.astype(f32)).astype(matmul_dtype)      # (E, 4H_pad)
    w_hh_p = jnp.zeros((H_pad, G_pad), f32).at[:H].set(
        pad_gate_cols(w_hh.astype(f32))).astype(matmul_dtype)          # (H_pad, 4H_pad)
    b_p = pad_gate_cols(b.astype(f32))                                 # (1, 4H_pad)
    w_fc_p = jnp.zeros((H_pad, V_pad), f32).at[:H, :V].set(
        w_fc.astype(f32)).astype(matmul_dtype)                         # (H_pad, V_pad)
    b_fc_p = jnp.zeros((1, V_pad), f32).at[:, :V].set(b_fc.astype(f32))

    # ---- embedding gather (XLA glue) -> time-major, padded ----
    embed_tm = jnp.take(emb_table.astype(f32), token_ids.T, axis=0)    # (T, B, E)
    embed_tm = jnp.pad(embed_tm, ((0, T_pad - T), (0, B_pad - B), (0, 0)))

    # ---- Kernel A: gates_x = x @ W_ih + b (parallel) ----
    gates_x = pl.pallas_call(
        _input_gates_kernel,
        out_shape=jax.ShapeDtypeStruct((T_pad, B_pad, G_pad), f32),
        grid_spec=pltpu.PrefetchScalarGridSpec(
            num_scalar_prefetch=0,
            grid=(n_chunks,),
            in_specs=[
                pl.BlockSpec((TT, B_pad, E), lambda t: (t, 0, 0)),
                pl.BlockSpec((E, G_pad), lambda t: (0, 0)),
                pl.BlockSpec((1, G_pad), lambda t: (0, 0)),
            ],
            out_specs=pl.BlockSpec((TT, B_pad, G_pad), lambda t: (t, 0, 0)),
        ),
        compiler_params=pltpu.CompilerParams(dimension_semantics=("parallel",)),
        cost_estimate=pl.CostEstimate(
            flops=2 * T_pad * B_pad * E * G_pad,
            transcendentals=0,
            bytes_accessed=4 * (T_pad * B_pad * E + E * G_pad + G_pad
                                + T_pad * B_pad * G_pad)),
    )(embed_tm, w_ih_p, b_p)

    # ---- Kernel B: serial recurrence (time-chunked) ----
    rec_kernel = functools.partial(_lstm_recurrence_kernel,
                                   chunk=TT, hidden_pad=H_pad)
    h_seq_tm = pl.pallas_call(
        rec_kernel,
        out_shape=jax.ShapeDtypeStruct((T_pad, B_pad, H_pad), f32),
        grid_spec=pltpu.PrefetchScalarGridSpec(
            num_scalar_prefetch=0,
            grid=(n_chunks,),
            in_specs=[
                pl.BlockSpec((TT, B_pad, G_pad), lambda t: (t, 0, 0)),
                pl.BlockSpec((H_pad, G_pad), lambda t: (0, 0)),
            ],
            out_specs=pl.BlockSpec((TT, B_pad, H_pad), lambda t: (t, 0, 0)),
            scratch_shapes=[
                pltpu.VMEM((B_pad, H_pad), f32),   # h state
                pltpu.VMEM((B_pad, H_pad), f32),   # c state
            ],
        ),
        compiler_params=pltpu.CompilerParams(dimension_semantics=("arbitrary",)),
        cost_estimate=pl.CostEstimate(
            flops=2 * T_pad * B_pad * H_pad * G_pad + 10 * T_pad * B_pad * H_pad,
            transcendentals=5 * T_pad * B_pad * H_pad,
            bytes_accessed=4 * (T_pad * B_pad * G_pad + H_pad * G_pad
                                + T_pad * B_pad * H_pad)),
    )(gates_x, w_hh_p)

    # Time-major -> batch-first relayout on the (small) hidden tensor, so the
    # big logits tensor is produced directly in its final (B, T, V) layout.
    h_seq_bt = jnp.transpose(h_seq_tm, (1, 0, 2))          # (B_pad, T_pad, H_pad)

    # ---- Kernel C: logits = h @ W_fc + b_fc (parallel, batch-first output) ----
    logits_p = pl.pallas_call(
        _fc_kernel,
        out_shape=jax.ShapeDtypeStruct((B_pad, T_pad, V_pad), f32),
        grid_spec=pltpu.PrefetchScalarGridSpec(
            num_scalar_prefetch=0,
            grid=(n_chunks,),
            in_specs=[
                pl.BlockSpec((B_pad, TT, H_pad), lambda t: (0, t, 0)),
                pl.BlockSpec((H_pad, V_pad), lambda t: (0, 0)),
                pl.BlockSpec((1, V_pad), lambda t: (0, 0)),
            ],
            out_specs=pl.BlockSpec((B_pad, TT, V_pad), lambda t: (0, t, 0)),
        ),
        compiler_params=pltpu.CompilerParams(dimension_semantics=("parallel",)),
        cost_estimate=pl.CostEstimate(
            flops=2 * T_pad * B_pad * H_pad * V_pad,
            transcendentals=0,
            bytes_accessed=4 * (T_pad * B_pad * H_pad + H_pad * V_pad + V_pad
                                + T_pad * B_pad * V_pad)),
    )(h_seq_bt, w_fc_p, b_fc_p)

    return logits_p[:B, :T, :V]


def type_predictor_reference(token_ids, params):
    """Pure-JAX reference (same math as torch Embedding -> LSTM -> Linear)."""
    emb = jnp.take(params["embedding"], token_ids, axis=0)   # (B, T, E)
    w_ih, w_hh, b = params["w_ih"], params["w_hh"], params["b"]
    w_fc, b_fc = params["w_fc"], params["b_fc"]
    B = emb.shape[0]
    H = w_hh.shape[0]

    def step(carry, x_t):                                    # x_t: (B, E)
        h, c = carry
        gates = x_t @ w_ih + h @ w_hh + b
        i = jax.nn.sigmoid(gates[:, 0 * H:1 * H])
        f = jax.nn.sigmoid(gates[:, 1 * H:2 * H])
        g = jnp.tanh(gates[:, 2 * H:3 * H])
        o = jax.nn.sigmoid(gates[:, 3 * H:4 * H])
        c = f * c + i * g
        h = o * jnp.tanh(c)
        return (h, c), h

    h0 = jnp.zeros((B, H), jnp.float32)
    _, hs = lax.scan(step, (h0, h0), jnp.transpose(emb, (1, 0, 2)))
    hs = jnp.transpose(hs, (1, 0, 2))                        # (B, T, H)
    return hs @ w_fc + b_fc


def init_params(key, vocab_size, embed_size, hidden_size):
    """Synthetic parameters matching nn.Embedding / nn.LSTM / nn.Linear shapes."""
    ks = jax.random.split(key, 7)
    H = hidden_size
    return {
        "embedding": jax.random.normal(ks[0], (vocab_size, embed_size), jnp.float32) * 0.1,
        # weight_ih_l0 (4H, E) stored transposed (E, 4H); gate order i,f,g,o
        "w_ih": jax.random.normal(ks[1], (embed_size, 4 * H), jnp.float32) * 0.1,
        # weight_hh_l0 (4H, H) stored transposed (H, 4H)
        "w_hh": jax.random.normal(ks[2], (hidden_size, 4 * H), jnp.float32) * 0.1,
        # b_ih + b_hh combined
        "b": (jax.random.normal(ks[3], (1, 4 * H), jnp.float32) * 0.1
              + jax.random.normal(ks[4], (1, 4 * H), jnp.float32) * 0.1),
        # fc.weight (V, H) stored transposed (H, V)
        "w_fc": jax.random.normal(ks[5], (hidden_size, vocab_size), jnp.float32) * 0.1,
        "b_fc": jax.random.normal(ks[6], (1, vocab_size), jnp.float32) * 0.1,
    }


if __name__ == "__main__":
    vocab_size, embed_size, hidden_size = 64, 32, 32
    batch, seq = 2, 8

    key = jax.random.PRNGKey(0)
    k_params, k_tokens = jax.random.split(key)

    params = init_params(k_params, vocab_size, embed_size, hidden_size)
    token_ids = jax.random.randint(k_tokens, (batch, seq), 0, vocab_size,
                                   dtype=jnp.int32)

    logits = jax.jit(type_predictor_forward)(token_ids, params)
    jax.block_until_ready(logits)

    assert logits.shape == (batch, seq, vocab_size)
    assert logits.dtype == jnp.float32

    ref = type_predictor_reference(token_ids, params)
    max_err = float(jnp.max(jnp.abs(logits - ref)))
    assert max_err < 1e-2, f"mismatch vs reference: max abs err = {max_err}"

    print("KERNEL_OK")
</pallas_src>

<mosaic_0001>
module attributes {stable_mosaic.version = 11 : i64} {
  func.func @_input_gates_kernel(%arg0: i32, %arg1: memref<8x8x32xf32, #tpu.memory_space<vmem>>, %arg2: memref<32x512xf32, #tpu.memory_space<vmem>>, %arg3: memref<1x512xf32, #tpu.memory_space<vmem>>, %arg4: memref<8x8x512xf32, #tpu.memory_space<vmem>>) attributes {dimension_semantics = [#tpu.dimension_semantics<parallel>], iteration_bounds = array<i64: 1>, scalar_prefetch = 0 : i64, scratch_operands = 0 : i64, tpu.core_type = #tpu.core_type<tc>, window_params = [{transform_indices = @transform_0, window_bounds = array<i64: 8, 8, 32>}, {pipeline_mode = #tpu.pipeline_mode<synchronous>, transform_indices = @transform_1, window_bounds = array<i64: 32, 512>}, {pipeline_mode = #tpu.pipeline_mode<synchronous>, transform_indices = @transform_2, window_bounds = array<i64: 1, 512>}, {transform_indices = @transform_3, window_bounds = array<i64: 8, 8, 512>}]} {
    %c0 = arith.constant 0 : index
    %c0_0 = arith.constant 0 : index
    %c0_1 = arith.constant 0 : index
    %0 = vector.load %arg1[%c0, %c0_0, %c0_1] : memref<8x8x32xf32, #tpu.memory_space<vmem>>, vector<8x8x32xf32>
    %1 = vector.shape_cast %0 : vector<8x8x32xf32> to vector<64x32xf32>
    %c0_2 = arith.constant 0 : index
    %c0_3 = arith.constant 0 : index
    %2 = vector.load %arg2[%c0_2, %c0_3] : memref<32x512xf32, #tpu.memory_space<vmem>>, vector<32x512xf32>
    %cst = arith.constant dense<0.000000e+00> : vector<64x512xf32>
    %3 = tpu.matmul %1, %2, %cst {dimension_numbers = #tpu.dot_dimension_numbers<[1], [0], [0], [1], [0, 0, 1, 1], [], []>} : vector<64x32xf32>, vector<32x512xf32>, vector<64x512xf32> -> vector<64x512xf32>
    %c0_4 = arith.constant 0 : index
    %c0_5 = arith.constant 0 : index
    %4 = vector.load %arg3[%c0_4, %c0_5] : memref<1x512xf32, #tpu.memory_space<vmem>>, vector<1x512xf32>
    %5 = vector.broadcast %4 : vector<1x512xf32> to vector<64x512xf32>
    %6 = arith.addf %3, %5 : vector<64x512xf32>
    %7 = vector.shape_cast %6 : vector<64x512xf32> to vector<8x8x512xf32>
    %c0_6 = arith.constant 0 : index
    %c0_7 = arith.constant 0 : index
    %c0_8 = arith.constant 0 : index
    %8 = vector.load %arg4[%c0_6, %c0_7, %c0_8] : memref<8x8x512xf32, #tpu.memory_space<vmem>>, vector<8x8x512xf32>
    tpu.vector_store %arg4[%c0_6, %c0_7, %c0_8], %7 {strides = array<i32>} : memref<8x8x512xf32, #tpu.memory_space<vmem>>, vector<8x8x512xf32>,
    return
  }
  func.func @transform_0(%arg0: i32) -> (i32, i32, i32) {
    %c0_i32 = arith.constant 0 : i32
    %c0_i32_0 = arith.constant 0 : i32
    %c0_i32_1 = arith.constant 0 : i32
    return %arg0, %c0_i32, %c0_i32_0 : i32, i32, i32
  }
  func.func @transform_1(%arg0: i32) -> (i32, i32) {
    %c0_i32 = arith.constant 0 : i32
    %c0_i32_0 = arith.constant 0 : i32
    %c0_i32_1 = arith.constant 0 : i32
    return %c0_i32, %c0_i32_0 : i32, i32
  }
  func.func @transform_2(%arg0: i32) -> (i32, i32) {
    %c0_i32 = arith.constant 0 : i32
    %c0_i32_0 = arith.constant 0 : i32
    %c0_i32_1 = arith.constant 0 : i32
    return %c0_i32, %c0_i32_0 : i32, i32
  }
  func.func @transform_3(%arg0: i32) -> (i32, i32, i32) {
    %c0_i32 = arith.constant 0 : i32
    %c0_i32_0 = arith.constant 0 : i32
    %c0_i32_1 = arith.constant 0 : i32
    return %arg0, %c0_i32, %c0_i32_0 : i32, i32, i32
  }
}

module attributes {stable_mosaic.version = 11 : i64} {
  func.func @_lstm_recurrence_kernel(%arg0: i32, %arg1: memref<8x8x512xf32, #tpu.memory_space<vmem>>, %arg2: memref<128x512xf32, #tpu.memory_space<vmem>>, %arg3: memref<8x8x128xf32, #tpu.memory_space<vmem>>, %arg4: memref<8x128xf32, #tpu.memory_space<vmem>>, %arg5: memref<8x128xf32, #tpu.memory_space<vmem>>) attributes {dimension_semantics = [#tpu.dimension_semantics<arbitrary>], iteration_bounds = array<i64: 1>, scalar_prefetch = 0 : i64, scratch_operands = 2 : i64, tpu.core_type = #tpu.core_type<tc>, window_params = [{transform_indices = @transform_0, window_bounds = array<i64: 8, 8, 512>}, {pipeline_mode = #tpu.pipeline_mode<synchronous>, transform_indices = @transform_1, window_bounds = array<i64: 128, 512>}, {transform_indices = @transform_2, window_bounds = array<i64: 8, 8, 128>}]} {
    %c0_i32 = arith.constant 0 : i32
    %0 = arith.cmpi eq, %arg0, %c0_i32 : i32
    %1 = arith.extui %0 : i1 to i32
    %c0_i32_0 = arith.constant 0 : i32
    %2 = arith.cmpi ne, %1, %c0_i32_0 : i32
    scf.if %2 {
      %cst_144 = arith.constant 0.000000e+00 : f32
      %315 = vector.broadcast %cst_144 : f32 to vector<8x128xf32>
      %c0_145 = arith.constant 0 : index
      %c0_146 = arith.constant 0 : index
      %316 = vector.load %arg4[%c0_145, %c0_146] : memref<8x128xf32, #tpu.memory_space<vmem>>, vector<8x128xf32>
      tpu.vector_store %arg4[%c0_145, %c0_146], %315 {strides = array<i32>} : memref<8x128xf32, #tpu.memory_space<vmem>>, vector<8x128xf32>,
      %cst_147 = arith.constant 0.000000e+00 : f32
      %317 = vector.broadcast %cst_147 : f32 to vector<8x128xf32>
      %c0_148 = arith.constant 0 : index
      %c0_149 = arith.constant 0 : index
      %318 = vector.load %arg5[%c0_148, %c0_149] : memref<8x128xf32, #tpu.memory_space<vmem>>, vector<8x128xf32>
      tpu.vector_store %arg5[%c0_148, %c0_149], %317 {strides = array<i32>} : memref<8x128xf32, #tpu.memory_space<vmem>>, vector<8x128xf32>,
    } else {
    }
    %c0_i32_1 = arith.constant 0 : i32
    %3 = arith.index_cast %c0_i32_1 : i32 to index
    %c0 = arith.constant 0 : index
    %c0_2 = arith.constant 0 : index
    %4 = vector.load %arg1[%3, %c0, %c0_2] : memref<8x8x512xf32, #tpu.memory_space<vmem>>, vector<1x8x512xf32>
    %5 = vector.shape_cast %4 : vector<1x8x512xf32> to vector<8x512xf32>
    %c0_3 = arith.constant 0 : index
    %c0_4 = arith.constant 0 : index
    %6 = vector.load %arg4[%c0_3, %c0_4] : memref<8x128xf32, #tpu.memory_space<vmem>>, vector<8x128xf32>
    %c0_5 = arith.constant 0 : index
    %c0_6 = arith.constant 0 : index
    %7 = vector.load %arg2[%c0_5, %c0_6] : memref<128x512xf32, #tpu.memory_space<vmem>>, vector<128x512xf32>
    %cst = arith.constant dense<0.000000e+00> : vector<8x512xf32>
    %8 = tpu.matmul %6, %7, %cst {dimension_numbers = #tpu.dot_dimension_numbers<[1], [0], [0], [1], [0, 0, 1, 1], [], []>} : vector<8x128xf32>, vector<128x512xf32>, vector<8x512xf32> -> vector<8x512xf32>
    %9 = arith.addf %5, %8 : vector<8x512xf32>
    %10 = vector.extract_strided_slice %9 {offsets = [0, 0], sizes = [8, 128], strides = [1, 1]} : vector<8x512xf32> to vector<8x128xf32>
    %11 = arith.negf %10 : vector<8x128xf32>
    %12 = math.exp %11 : vector<8x128xf32>
    %cst_7 = arith.constant 1.000000e+00 : f32
    %13 = vector.broadcast %cst_7 : f32 to vector<8x128xf32>
    %14 = arith.addf %13, %12 : vector<8x128xf32>
    %15 = arith.divf %13, %14 : vector<8x128xf32>
    %16 = vector.extract_strided_slice %9 {offsets = [0, 128], sizes = [8, 128], strides = [1, 1]} : vector<8x512xf32> to vector<8x128xf32>
    %17 = arith.negf %16 : vector<8x128xf32>
    %18 = math.exp %17 : vector<8x128xf32>
    %cst_8 = arith.constant 1.000000e+00 : f32
    %19 = vector.broadcast %cst_8 : f32 to vector<8x128xf32>
    %20 = arith.addf %19, %18 : vector<8x128xf32>
    %21 = arith.divf %19, %20 : vector<8x128xf32>
    %22 = vector.extract_strided_slice %9 {offsets = [0, 256], sizes = [8, 128], strides = [1, 1]} : vector<8x512xf32> to vector<8x128xf32>
    %23 = math.tanh %22 : vector<8x128xf32>
    %24 = vector.extract_strided_slice %9 {offsets = [0, 384], sizes = [8, 128], strides = [1, 1]} : vector<8x512xf32> to vector<8x128xf32>
    %25 = arith.negf %24 : vector<8x128xf32>
    %26 = math.exp %25 : vector<8x128xf32>
    %cst_9 = arith.constant 1.000000e+00 : f32
    %27 = vector.broadcast %cst_9 : f32 to vector<8x128xf32>
    %28 = arith.addf %27, %26 : vector<8x128xf32>
    %29 = arith.divf %27, %28 : vector<8x128xf32>
    %c0_10 = arith.constant 0 : index
    %c0_11 = arith.constant 0 : index
    %30 = vector.load %arg5[%c0_10, %c0_11] : memref<8x128xf32, #tpu.memory_space<vmem>>, vector<8x128xf32>
    %31 = arith.mulf %21, %30 : vector<8x128xf32>
    %32 = arith.mulf %15, %23 : vector<8x128xf32>
    %33 = arith.addf %31, %32 : vector<8x128xf32>
    %34 = math.tanh %33 : vector<8x128xf32>
    %35 = arith.mulf %29, %34 : vector<8x128xf32>
    %c0_12 = arith.constant 0 : index
    %c0_13 = arith.constant 0 : index
    %36 = vector.load %arg5[%c0_12, %c0_13] : memref<8x128xf32, #tpu.memory_space<vmem>>, vector<8x128xf32>
    tpu.vector_store %arg5[%c0_12, %c0_13], %33 {strides = array<i32>} : memref<8x128xf32, #tpu.memory_space<vmem>>, vector<8x128xf32>,
    %c0_14 = arith.constant 0 : index
    %c0_15 = arith.constant 0 : index
    %37 = vector.load %arg4[%c0_14, %c0_15] : memref<8x128xf32, #tpu.memory_space<vmem>>, vector<8x128xf32>
    tpu.vector_store %arg4[%c0_14, %c0_15], %35 {strides = array<i32>} : memref<8x128xf32, #tpu.memory_space<vmem>>, vector<8x128xf32>,
    %38 = arith.index_cast %c0_i32_1 : i32 to index
    %c0_16 = arith.constant 0 : index
    %c0_17 = arith.constant 0 : index
    %39 = vector.load %arg3[%38, %c0_16, %c0_17] : memref<8x8x128xf32, #tpu.memory_space<vmem>>, vector<1x8x128xf32>
    %40 = vector.shape_cast %39 : vector<1x8x128xf32> to vector<8x128xf32>
    %41 = vector.shape_cast %35 : vector<8x128xf32> to vector<1x8x128xf32>
    tpu.vector_store %arg3[%38, %c0_16, %c0_17], %41 {strides = array<i32>} : memref<8x8x128xf32, #tpu.memory_space<vmem>>, vector<1x8x128xf32>,
    %c1_i32 = arith.constant 1 : i32
    %42 = arith.index_cast %c1_i32 : i32 to index
    %c0_18 = arith.constant 0 : index
    %c0_19 = arith.constant 0 : index
    %43 = vector.load %arg1[%42, %c0_18, %c0_19] : memref<8x8x512xf32, #tpu.memory_space<vmem>>, vector<1x8x512xf32>
    %44 = vector.shape_cast %43 : vector<1x8x512xf32> to vector<8x512xf32>
    %c0_20 = arith.constant 0 : index
    %c0_21 = arith.constant 0 : index
    %45 = vector.load %arg4[%c0_20, %c0_21] : memref<8x128xf32, #tpu.memory_space<vmem>>, vector<8x128xf32>
    %c0_22 = arith.constant 0 : index
    %c0_23 = arith.constant 0 : index
    %46 = vector.load %arg2[%c0_22, %c0_23] : memref<128x512xf32, #tpu.memory_space<vmem>>, vector<128x512xf32>
    %cst_24 = arith.constant dense<0.000000e+00> : vector<8x512xf32>
    %47 = tpu.matmul %45, %46, %cst_24 {dimension_numbers = #tpu.dot_dimension_numbers<[1], [0], [0], [1], [0, 0, 1, 1], [], []>} : vector<8x128xf32>, vector<128x512xf32>, vector<8x512xf32> -> vector<8x512xf32>
    %48 = arith.addf %44, %47 : vector<8x512xf32>
    %49 = vector.extract_strided_slice %48 {offsets = [0, 0], sizes = [8, 128], strides = [1, 1]} : vector<8x512xf32> to vector<8x128xf32>
    %50 = arith.negf %49 : vector<8x128xf32>
    %51 = math.exp %50 : vector<8x128xf32>
    %cst_25 = arith.constant 1.000000e+00 : f32
    %52 = vector.broadcast %cst_25 : f32 to vector<8x128xf32>
    %53 = arith.addf %52, %51 : vector<8x128xf32>
    %54 = arith.divf %52, %53 : vector<8x128xf32>
    %55 = vector.extract_strided_slice %48 {offsets = [0, 128], sizes = [8, 128], strides = [1, 1]} : vector<8x512xf32> to vector<8x128xf32>
    %56 = arith.negf %55 : vector<8x128xf32>
    %57 = math.exp %56 : vector<8x128xf32>
    %cst_26 = arith.constant 1.000000e+00 : f32
    %58 = vector.broadcast %cst_26 : f32 to vector<8x128xf32>
    %59 = arith.addf %58, %57 : vector<8x128xf32>
    %60 = arith.divf %58, %59 : vector<8x128xf32>
    %61 = vector.extract_strided_slice %48 {offsets = [0, 256], sizes = [8, 128], strides = [1, 1]} : vector<8x512xf32> to vector<8x128xf32>
    %62 = math.tanh %61 : vector<8x128xf32>
    %63 = vector.extract_strided_slice %48 {offsets = [0, 384], sizes = [8, 128], strides = [1, 1]} : vector<8x512xf32> to vector<8x128xf32>
    %64 = arith.negf %63 : vector<8x128xf32>
    %65 = math.exp %64 : vector<8x128xf32>
    %cst_27 = arith.constant 1.000000e+00 : f32
    %66 = vector.broadcast %cst_27 : f32 to vector<8x128xf32>
    %67 = arith.addf %66, %65 : vector<8x128xf32>
    %68 = arith.divf %66, %67 : vector<8x128xf32>
    %c0_28 = arith.constant 0 : index
    %c0_29 = arith.constant 0 : index
    %69 = vector.load %arg5[%c0_28, %c0_29] : memref<8x128xf32, #tpu.memory_space<vmem>>, vector<8x128xf32>
    %70 = arith.mulf %60, %69 : vector<8x128xf32>
    %71 = arith.mulf %54, %62 : vector<8x128xf32>
    %72 = arith.addf %70, %71 : vector<8x128xf32>
    %73 = math.tanh %72 : vector<8x128xf32>
    %74 = arith.mulf %68, %73 : vector<8x128xf32>
    %c0_30 = arith.constant 0 : index
    %c0_31 = arith.constant 0 : index
    %75 = vector.load %arg5[%c0_30, %c0_31] : memref<8x128xf32, #tpu.memory_space<vmem>>, vector<8x128xf32>
    tpu.vector_store %arg5[%c0_30, %c0_31], %72 {strides = array<i32>} : memref<8x128xf32, #tpu.memory_space<vmem>>, vector<8x128xf32>,
    %c0_32 = arith.constant 0 : index
    %c0_33 = arith.constant 0 : index
    %76 = vector.load %arg4[%c0_32, %c0_33] : memref<8x128xf32, #tpu.memory_space<vmem>>, vector<8x128xf32>
    tpu.vector_store %arg4[%c0_32, %c0_33], %74 {strides = array<i32>} : memref<8x128xf32, #tpu.memory_space<vmem>>, vector<8x128xf32>,
    %77 = arith.index_cast %c1_i32 : i32 to index
    %c0_34 = arith.constant 0 : index
    %c0_35 = arith.constant 0 : index
    %78 = vector.load %arg3[%77, %c0_34, %c0_35] : memref<8x8x128xf32, #tpu.memory_space<vmem>>, vector<1x8x128xf32>
    %79 = vector.shape_cast %78 : vector<1x8x128xf32> to vector<8x128xf32>
    %80 = vector.shape_cast %74 : vector<8x128xf32> to vector<1x8x128xf32>
    tpu.vector_store %arg3[%77, %c0_34, %c0_35], %80 {strides = array<i32>} : memref<8x8x128xf32, #tpu.memory_space<vmem>>, vector<1x8x128xf32>,
    %c2_i32 = arith.constant 2 : i32
    %81 = arith.index_cast %c2_i32 : i32 to index
    %c0_36 = arith.constant 0 : index
    %c0_37 = arith.constant 0 : index
    %82 = vector.load %arg1[%81, %c0_36, %c0_37] : memref<8x8x512xf32, #tpu.memory_space<vmem>>, vector<1x8x512xf32>
    %83 = vector.shape_cast %82 : vector<1x8x512xf32> to vector<8x512xf32>
    %c0_38 = arith.constant 0 : index
    %c0_39 = arith.constant 0 : index
    %84 = vector.load %arg4[%c0_38, %c0_39] : memref<8x128xf32, #tpu.memory_space<vmem>>, vector<8x128xf32>
    %c0_40 = arith.constant 0 : index
    %c0_41 = arith.constant 0 : index
    %85 = vector.load %arg2[%c0_40, %c0_41] : memref<128x512xf32, #tpu.memory_space<vmem>>, vector<128x512xf32>
    %cst_42 = arith.constant dense<0.000000e+00> : vector<8x512xf32>
    %86 = tpu.matmul %84, %85, %cst_42 {dimension_numbers = #tpu.dot_dimension_numbers<[1], [0], [0], [1], [0, 0, 1, 1], [], []>} : vector<8x128xf32>, vector<128x512xf32>, vector<8x512xf32> -> vector<8x512xf32>
    %87 = arith.addf %83, %86 : vector<8x512xf32>
    %88 = vector.extract_strided_slice %87 {offsets = [0, 0], sizes = [8, 128], strides = [1, 1]} : vector<8x512xf32> to vector<8x128xf32>
    %89 = arith.negf %88 : vector<8x128xf32>
    %90 = math.exp %89 : vector<8x128xf32>
    %cst_43 = arith.constant 1.000000e+00 : f32
    %91 = vector.broadcast %cst_43 : f32 to vector<8x128xf32>
    %92 = arith.addf %91, %90 : vector<8x128xf32>
    %93 = arith.divf %91, %92 : vector<8x128xf32>
    %94 = vector.extract_strided_slice %87 {offsets = [0, 128], sizes = [8, 128], strides = [1, 1]} : vector<8x512xf32> to vector<8x128xf32>
    %95 = arith.negf %94 : vector<8x128xf32>
    %96 = math.exp %95 : vector<8x128xf32>
    %cst_44 = arith.constant 1.000000e+00 : f32
    %97 = vector.broadcast %cst_44 : f32 to vector<8x128xf32>
    %98 = arith.addf %97, %96 : vector<8x128xf32>
    %99 = arith.divf %97, %98 : vector<8x128xf32>
    %100 = vector.extract_strided_slice %87 {offsets = [0, 256], sizes = [8, 128], strides = [1, 1]} : vector<8x512xf32> to vector<8x128xf32>
    %101 = math.tanh %100 : vector<8x128xf32>
    %102 = vector.extract_strided_slice %87 {offsets = [0, 384], sizes = [8, 128], strides = [1, 1]} : vector<8x512xf32> to vector<8x128xf32>
    %103 = arith.negf %102 : vector<8x128xf32>
    %104 = math.exp %103 : vector<8x128xf32>
    %cst_45 = arith.constant 1.000000e+00 : f32
    %105 = vector.broadcast %cst_45 : f32 to vector<8x128xf32>
    %106 = arith.addf %105, %104 : vector<8x128xf32>
    %107 = arith.divf %105, %106 : vector<8x128xf32>
    %c0_46 = arith.constant 0 : index
    %c0_47 = arith.constant 0 : index
    %108 = vector.load %arg5[%c0_46, %c0_47] : memref<8x128xf32, #tpu.memory_space<vmem>>, vector<8x128xf32>
    %109 = arith.mulf %99, %108 : vector<8x128xf32>
    %110 = arith.mulf %93, %101 : vector<8x128xf32>
    %111 = arith.addf %109, %110 : vector<8x128xf32>
    %112 = math.tanh %111 : vector<8x128xf32>
    %113 = arith.mulf %107, %112 : vector<8x128xf32>
    %c0_48 = arith.constant 0 : index
    %c0_49 = arith.constant 0 : index
    %114 = vector.load %arg5[%c0_48, %c0_49] : memref<8x128xf32, #tpu.memory_space<vmem>>, vector<8x128xf32>
    tpu.vector_store %arg5[%c0_48, %c0_49], %111 {strides = array<i32>} : memref<8x128xf32, #tpu.memory_space<vmem>>, vector<8x128xf32>,
    %c0_50 = arith.constant 0 : index
    %c0_51 = arith.constant 0 : index
    %115 = vector.load %arg4[%c0_50, %c0_51] : memref<8x128xf32, #tpu.memory_space<vmem>>, vector<8x128xf32>
    tpu.vector_store %arg4[%c0_50, %c0_51], %113 {strides = array<i32>} : memref<8x128xf32, #tpu.memory_space<vmem>>, vector<8x128xf32>,
    %116 = arith.index_cast %c2_i32 : i32 to index
    %c0_52 = arith.constant 0 : index
    %c0_53 = arith.constant 0 : index
    %117 = vector.load %arg3[%116, %c0_52, %c0_53] : memref<8x8x128xf32, #tpu.memory_space<vmem>>, vector<1x8x128xf32>
    %118 = vector.shape_cast %117 : vector<1x8x128xf32> to vector<8x128xf32>
    %119 = vector.shape_cast %113 : vector<8x128xf32> to vector<1x8x128xf32>
    tpu.vector_store %arg3[%116, %c0_52, %c0_53], %119 {strides = array<i32>} : memref<8x8x128xf32, #tpu.memory_space<vmem>>, vector<1x8x128xf32>,
    %c3_i32 = arith.constant 3 : i32
    %120 = arith.index_cast %c3_i32 : i32 to index
    %c0_54 = arith.constant 0 : index
    %c0_55 = arith.constant 0 : index
    %121 = vector.load %arg1[%120, %c0_54, %c0_55] : memref<8x8x512xf32, #tpu.memory_space<vmem>>, vector<1x8x512xf32>
    %122 = vector.shape_cast %121 : vector<1x8x512xf32> to vector<8x512xf32>
    %c0_56 = arith.constant 0 : index
    %c0_57 = arith.constant 0 : index
    %123 = vector.load %arg4[%c0_56, %c0_57] : memref<8x128xf32, #tpu.memory_space<vmem>>, vector<8x128xf32>
    %c0_58 = arith.constant 0 : index
    %c0_59 = arith.constant 0 : index
    %124 = vector.load %arg2[%c0_58, %c0_59] : memref<128x512xf32, #tpu.memory_space<vmem>>, vector<128x512xf32>
    %cst_60 = arith.constant dense<0.000000e+00> : vector<8x512xf32>
    %125 = tpu.matmul %123, %124, %cst_60 {dimension_numbers = #tpu.dot_dimension_numbers<[1], [0], [0], [1], [0, 0, 1, 1], [], []>} : vector<8x128xf32>, vector<128x512xf32>, vector<8x512xf32> -> vector<8x512xf32>
    %126 = arith.addf %122, %125 : vector<8x512xf32>
    %127 = vector.extract_strided_slice %126 {offsets = [0, 0], sizes = [8, 128], strides = [1, 1]} : vector<8x512xf32> to vector<8x128xf32>
    %128 = arith.negf %127 : vector<8x128xf32>
    %129 = math.exp %128 : vector<8x128xf32>
    %cst_61 = arith.constant 1.000000e+00 : f32
    %130 = vector.broadcast %cst_61 : f32 to vector<8x128xf32>
    %131 = arith.addf %130, %129 : vector<8x128xf32>
    %132 = arith.divf %130, %131 : vector<8x128xf32>
    %133 = vector.extract_strided_slice %126 {offsets = [0, 128], sizes = [8, 128], strides = [1, 1]} : vector<8x512xf32> to vector<8x128xf32>
    %134 = arith.negf %133 : vector<8x128xf32>
    %135 = math.exp %134 : vector<8x128xf32>
    %cst_62 = arith.constant 1.000000e+00 : f32
    %136 = vector.broadcast %cst_62 : f32 to vector<8x128xf32>
    %137 = arith.addf %136, %135 : vector<8x128xf32>
    %138 = arith.divf %136, %137 : vector<8x128xf32>
    %139 = vector.extract_strided_slice %126 {offsets = [0, 256], sizes = [8, 128], strides = [1, 1]} : vector<8x512xf32> to vector<8x128xf32>
    %140 = math.tanh %139 : vector<8x128xf32>
    %141 = vector.extract_strided_slice %126 {offsets = [0, 384], sizes = [8, 128], strides = [1, 1]} : vector<8x512xf32> to vector<8x128xf32>
    %142 = arith.negf %141 : vector<8x128xf32>
    %143 = math.exp %142 : vector<8x128xf32>
    %cst_63 = arith.constant 1.000000e+00 : f32
    %144 = vector.broadcast %cst_63 : f32 to vector<8x128xf32>
    %145 = arith.addf %144, %143 : vector<8x128xf32>
    %146 = arith.divf %144, %145 : vector<8x128xf32>
    %c0_64 = arith.constant 0 : index
    %c0_65 = arith.constant 0 : index
    %147 = vector.load %arg5[%c0_64, %c0_65] : memref<8x128xf32, #tpu.memory_space<vmem>>, vector<8x128xf32>
    %148 = arith.mulf %138, %147 : vector<8x128xf32>
    %149 = arith.mulf %132, %140 : vector<8x128xf32>
    %150 = arith.addf %148, %149 : vector<8x128xf32>
    %151 = math.tanh %150 : vector<8x128xf32>
    %152 = arith.mulf %146, %151 : vector<8x128xf32>
    %c0_66 = arith.constant 0 : index
    %c0_67 = arith.constant 0 : index
    %153 = vector.load %arg5[%c0_66, %c0_67] : memref<8x128xf32, #tpu.memory_space<vmem>>, vector<8x128xf32>
    tpu.vector_store %arg5[%c0_66, %c0_67], %150 {strides = array<i32>} : memref<8x128xf32, #tpu.memory_space<vmem>>, vector<8x128xf32>,
    %c0_68 = arith.constant 0 : index
    %c0_69 = arith.constant 0 : index
    %154 = vector.load %arg4[%c0_68, %c0_69] : memref<8x128xf32, #tpu.memory_space<vmem>>, vector<8x128xf32>
    tpu.vector_store %arg4[%c0_68, %c0_69], %152 {strides = array<i32>} : memref<8x128xf32, #tpu.memory_space<vmem>>, vector<8x128xf32>,
    %155 = arith.index_cast %c3_i32 : i32 to index
    %c0_70 = arith.constant 0 : index
    %c0_71 = arith.constant 0 : index
    %156 = vector.load %arg3[%155, %c0_70, %c0_71] : memref<8x8x128xf32, #tpu.memory_space<vmem>>, vector<1x8x128xf32>
    %157 = vector.shape_cast %156 : vector<1x8x128xf32> to vector<8x128xf32>
    %158 = vector.shape_cast %152 : vector<8x128xf32> to vector<1x8x128xf32>
    tpu.vector_store %arg3[%155, %c0_70, %c0_71], %158 {strides = array<i32>} : memref<8x8x128xf32, #tpu.memory_space<vmem>>, vector<1x8x128xf32>,
    %c4_i32 = arith.constant 4 : i32
    %159 = arith.index_cast %c4_i32 : i32 to index
    %c0_72 = arith.constant 0 : index
    %c0_73 = arith.constant 0 : index
    %160 = vector.load %arg1[%159, %c0_72, %c0_73] : memref<8x8x512xf32, #tpu.memory_space<vmem>>, vector<1x8x512xf32>
    %161 = vector.shape_cast %160 : vector<1x8x512xf32> to vector<8x512xf32>
    %c0_74 = arith.constant 0 : index
    %c0_75 = arith.constant 0 : index
    %162 = vector.load %arg4[%c0_74, %c0_75] : memref<8x128xf32, #tpu.memory_space<vmem>>, vector<8x128xf32>
    %c0_76 = arith.constant 0 : index
    %c0_77 = arith.constant 0 : index
    %163 = vector.load %arg2[%c0_76, %c0_77] : memref<128x512xf32, #tpu.memory_space<vmem>>, vector<128x512xf32>
    %cst_78 = arith.constant dense<0.000000e+00> : vector<8x512xf32>
    %164 = tpu.matmul %162, %163, %cst_78 {dimension_numbers = #tpu.dot_dimension_numbers<[1], [0], [0], [1], [0, 0, 1, 1], [], []>} : vector<8x128xf32>, vector<128x512xf32>, vector<8x512xf32> -> vector<8x512xf32>
    %165 = arith.addf %161, %164 : vector<8x512xf32>
    %166 = vector.extract_strided_slice %165 {offsets = [0, 0], sizes = [8, 128], strides = [1, 1]} : vector<8x512xf32> to vector<8x128xf32>
    %167 = arith.negf %166 : vector<8x128xf32>
    %168 = math.exp %167 : vector<8x128xf32>
    %cst_79 = arith.constant 1.000000e+00 : f32
    %169 = vector.broadcast %cst_79 : f32 to vector<8x128xf32>
    %170 = arith.addf %169, %168 : vector<8x128xf32>
    %171 = arith.divf %169, %170 : vector<8x128xf32>
    %172 = vector.extract_strided_slice %165 {offsets = [0, 128], sizes = [8, 128], strides = [1, 1]} : vector<8x512xf32> to vector<8x128xf32>
    %173 = arith.negf %172 : vector<8x128xf32>
    %174 = math.exp %173 : vector<8x128xf32>
    %cst_80 = arith.constant 1.000000e+00 : f32
    %175 = vector.broadcast %cst_80 : f32 to vector<8x128xf32>
    %176 = arith.addf %175, %174 : vector<8x128xf32>
    %177 = arith.divf %175, %176 : vector<8x128xf32>
    %178 = vector.extract_strided_slice %165 {offsets = [0, 256], sizes = [8, 128], strides = [1, 1]} : vector<8x512xf32> to vector<8x128xf32>
    %179 = math.tanh %178 : vector<8x128xf32>
    %180 = vector.extract_strided_slice %165 {offsets = [0, 384], sizes = [8, 128], strides = [1, 1]} : vector<8x512xf32> to vector<8x128xf32>
    %181 = arith.negf %180 : vector<8x128xf32>
    %182 = math.exp %181 : vector<8x128xf32>
    %cst_81 = arith.constant 1.000000e+00 : f32
    %183 = vector.broadcast %cst_81 : f32 to vector<8x128xf32>
    %184 = arith.addf %183, %182 : vector<8x128xf32>
    %185 = arith.divf %183, %184 : vector<8x128xf32>
    %c0_82 = arith.constant 0 : index
    %c0_83 = arith.constant 0 : index
    %186 = vector.load %arg5[%c0_82, %c0_83] : memref<8x128xf32, #tpu.memory_space<vmem>>, vector<8x128xf32>
    %187 = arith.mulf %177, %186 : vector<8x128xf32>
    %188 = arith.mulf %171, %179 : vector<8x128xf32>
    %189 = arith.addf %187, %188 : vector<8x128xf32>
    %190 = math.tanh %189 : vector<8x128xf32>
    %191 = arith.mulf %185, %190 : vector<8x128xf32>
    %c0_84 = arith.constant 0 : index
    %c0_85 = arith.constant 0 : index
    %192 = vector.load %arg5[%c0_84, %c0_85] : memref<8x128xf32, #tpu.memory_space<vmem>>, vector<8x128xf32>
    tpu.vector_store %arg5[%c0_84, %c0_85], %189 {strides = array<i32>} : memref<8x128xf32, #tpu.memory_space<vmem>>, vector<8x128xf32>,
    %c0_86 = arith.constant 0 : index
    %c0_87 = arith.constant 0 : index
    %193 = vector.load %arg4[%c0_86, %c0_87] : memref<8x128xf32, #tpu.memory_space<vmem>>, vector<8x128xf32>
    tpu.vector_store %arg4[%c0_86, %c0_87], %191 {strides = array<i32>} : memref<8x128xf32, #tpu.memory_space<vmem>>, vector<8x128xf32>,
    %194 = arith.index_cast %c4_i32 : i32 to index
    %c0_88 = arith.constant 0 : index
    %c0_89 = arith.constant 0 : index
    %195 = vector.load %arg3[%194, %c0_88, %c0_89] : memref<8x8x128xf32, #tpu.memory_space<vmem>>, vector<1x8x128xf32>
    %196 = vector.shape_cast %195 : vector<1x8x128xf32> to vector<8x128xf32>
    %197 = vector.shape_cast %191 : vector<8x128xf32> to vector<1x8x128xf32>
    tpu.vector_store %arg3[%194, %c0_88, %c0_89], %197 {strides = array<i32>} : memref<8x8x128xf32, #tpu.memory_space<vmem>>, vector<1x8x128xf32>,
    %c5_i32 = arith.constant 5 : i32
    %198 = arith.index_cast %c5_i32 : i32 to index
    %c0_90 = arith.constant 0 : index
    %c0_91 = arith.constant 0 : index
    %199 = vector.load %arg1[%198, %c0_90, %c0_91] : memref<8x8x512xf32, #tpu.memory_space<vmem>>, vector<1x8x512xf32>
    %200 = vector.shape_cast %199 : vector<1x8x512xf32> to vector<8x512xf32>
    %c0_92 = arith.constant 0 : index
    %c0_93 = arith.constant 0 : index
    %201 = vector.load %arg4[%c0_92, %c0_93] : memref<8x128xf32, #tpu.memory_space<vmem>>, vector<8x128xf32>
    %c0_94 = arith.constant 0 : index
    %c0_95 = arith.constant 0 : index
    %202 = vector.load %arg2[%c0_94, %c0_95] : memref<128x512xf32, #tpu.memory_space<vmem>>, vector<128x512xf32>
    %cst_96 = arith.constant dense<0.000000e+00> : vector<8x512xf32>
    %203 = tpu.matmul %201, %202, %cst_96 {dimension_numbers = #tpu.dot_dimension_numbers<[1], [0], [0], [1], [0, 0, 1, 1], [], []>} : vector<8x128xf32>, vector<128x512xf32>, vector<8x512xf32> -> vector<8x512xf32>
    %204 = arith.addf %200, %203 : vector<8x512xf32>
    %205 = vector.extract_strided_slice %204 {offsets = [0, 0], sizes = [8, 128], strides = [1, 1]} : vector<8x512xf32> to vector<8x128xf32>
    %206 = arith.negf %205 : vector<8x128xf32>
    %207 = math.exp %206 : vector<8x128xf32>
    %cst_97 = arith.constant 1.000000e+00 : f32
    %208 = vector.broadcast %cst_97 : f32 to vector<8x128xf32>
    %209 = arith.addf %208, %207 : vector<8x128xf32>
    %210 = arith.divf %208, %209 : vector<8x128xf32>
    %211 = vector.extract_strided_slice %204 {offsets = [0, 128], sizes = [8, 128], strides = [1, 1]} : vector<8x512xf32> to vector<8x128xf32>
    %212 = arith.negf %211 : vector<8x128xf32>
    %213 = math.exp %212 : vector<8x128xf32>
    %cst_98 = arith.constant 1.000000e+00 : f32
    %214 = vector.broadcast %cst_98 : f32 to vector<8x128xf32>
    %215 = arith.addf %214, %213 : vector<8x128xf32>
    %216 = arith.divf %214, %215 : vector<8x128xf32>
    %217 = vector.extract_strided_slice %204 {offsets = [0, 256], sizes = [8, 128], strides = [1, 1]} : vector<8x512xf32> to vector<8x128xf32>
    %218 = math.tanh %217 : vector<8x128xf32>
    %219 = vector.extract_strided_slice %204 {offsets = [0, 384], sizes = [8, 128], strides = [1, 1]} : vector<8x512xf32> to vector<8x128xf32>
    %220 = arith.negf %219 : vector<8x128xf32>
    %221 = math.exp %220 : vector<8x128xf32>
    %cst_99 = arith.constant 1.000000e+00 : f32
    %222 = vector.broadcast %cst_99 : f32 to vector<8x128xf32>
    %223 = arith.addf %222, %221 : vector<8x128xf32>
    %224 = arith.divf %222, %223 : vector<8x128xf32>
    %c0_100 = arith.constant 0 : index
    %c0_101 = arith.constant 0 : index
    %225 = vector.load %arg5[%c0_100, %c0_101] : memref<8x128xf32, #tpu.memory_space<vmem>>, vector<8x128xf32>
    %226 = arith.mulf %216, %225 : vector<8x128xf32>
    %227 = arith.mulf %210, %218 : vector<8x128xf32>
    %228 = arith.addf %226, %227 : vector<8x128xf32>
    %229 = math.tanh %228 : vector<8x128xf32>
    %230 = arith.mulf %224, %229 : vector<8x128xf32>
    %c0_102 = arith.constant 0 : index
    %c0_103 = arith.constant 0 : index
    %231 = vector.load %arg5[%c0_102, %c0_103] : memref<8x128xf32, #tpu.memory_space<vmem>>, vector<8x128xf32>
    tpu.vector_store %arg5[%c0_102, %c0_103], %228 {strides = array<i32>} : memref<8x128xf32, #tpu.memory_space<vmem>>, vector<8x128xf32>,
    %c0_104 = arith.constant 0 : index
    %c0_105 = arith.constant 0 : index
    %232 = vector.load %arg4[%c0_104, %c0_105] : memref<8x128xf32, #tpu.memory_space<vmem>>, vector<8x128xf32>
    tpu.vector_store %arg4[%c0_104, %c0_105], %230 {strides = array<i32>} : memref<8x128xf32, #tpu.memory_space<vmem>>, vector<8x128xf32>,
    %233 = arith.index_cast %c5_i32 : i32 to index
    %c0_106 = arith.constant 0 : index
    %c0_107 = arith.constant 0 : index
    %234 = vector.load %arg3[%233, %c0_106, %c0_107] : memref<8x8x128xf32, #tpu.memory_space<vmem>>, vector<1x8x128xf32>
    %235 = vector.shape_cast %234 : vector<1x8x128xf32> to vector<8x128xf32>
    %236 = vector.shape_cast %230 : vector<8x128xf32> to vector<1x8x128xf32>
    tpu.vector_store %arg3[%233, %c0_106, %c0_107], %236 {strides = array<i32>} : memref<8x8x128xf32, #tpu.memory_space<vmem>>, vector<1x8x128xf32>,
    %c6_i32 = arith.constant 6 : i32
    %237 = arith.index_cast %c6_i32 : i32 to index
    %c0_108 = arith.constant 0 : index
    %c0_109 = arith.constant 0 : index
    %238 = vector.load %arg1[%237, %c0_108, %c0_109] : memref<8x8x512xf32, #tpu.memory_space<vmem>>, vector<1x8x512xf32>
    %239 = vector.shape_cast %238 : vector<1x8x512xf32> to vector<8x512xf32>
    %c0_110 = arith.constant 0 : index
    %c0_111 = arith.constant 0 : index
    %240 = vector.load %arg4[%c0_110, %c0_111] : memref<8x128xf32, #tpu.memory_space<vmem>>, vector<8x128xf32>
    %c0_112 = arith.constant 0 : index
    %c0_113 = arith.constant 0 : index
    %241 = vector.load %arg2[%c0_112, %c0_113] : memref<128x512xf32, #tpu.memory_space<vmem>>, vector<128x512xf32>
    %cst_114 = arith.constant dense<0.000000e+00> : vector<8x512xf32>
    %242 = tpu.matmul %240, %241, %cst_114 {dimension_numbers = #tpu.dot_dimension_numbers<[1], [0], [0], [1], [0, 0, 1, 1], [], []>} : vector<8x128xf32>, vector<128x512xf32>, vector<8x512xf32> -> vector<8x512xf32>
    %243 = arith.addf %239, %242 : vector<8x512xf32>
    %244 = vector.extract_strided_slice %243 {offsets = [0, 0], sizes = [8, 128], strides = [1, 1]} : vector<8x512xf32> to vector<8x128xf32>
    %245 = arith.negf %244 : vector<8x128xf32>
    %246 = math.exp %245 : vector<8x128xf32>
    %cst_115 = arith.constant 1.000000e+00 : f32
    %247 = vector.broadcast %cst_115 : f32 to vector<8x128xf32>
    %248 = arith.addf %247, %246 : vector<8x128xf32>
    %249 = arith.divf %247, %248 : vector<8x128xf32>
    %250 = vector.extract_strided_slice %243 {offsets = [0, 128], sizes = [8, 128], strides = [1, 1]} : vector<8x512xf32> to vector<8x128xf32>
    %251 = arith.negf %250 : vector<8x128xf32>
    %252 = math.exp %251 : vector<8x128xf32>
    %cst_116 = arith.constant 1.000000e+00 : f32
    %253 = vector.broadcast %cst_116 : f32 to vector<8x128xf32>
    %254 = arith.addf %253, %252 : vector<8x128xf32>
    %255 = arith.divf %253, %254 : vector<8x128xf32>
    %256 = vector.extract_strided_slice %243 {offsets = [0, 256], sizes = [8, 128], strides = [1, 1]} : vector<8x512xf32> to vector<8x128xf32>
    %257 = math.tanh %256 : vector<8x128xf32>
    %258 = vector.extract_strided_slice %243 {offsets = [0, 384], sizes = [8, 128], strides = [1, 1]} : vector<8x512xf32> to vector<8x128xf32>
    %259 = arith.negf %258 : vector<8x128xf32>
    %260 = math.exp %259 : vector<8x128xf32>
    %cst_117 = arith.constant 1.000000e+00 : f32
    %261 = vector.broadcast %cst_117 : f32 to vector<8x128xf32>
    %262 = arith.addf %261, %260 : vector<8x128xf32>
    %263 = arith.divf %261, %262 : vector<8x128xf32>
    %c0_118 = arith.constant 0 : index
    %c0_119 = arith.constant 0 : index
    %264 = vector.load %arg5[%c0_118, %c0_119] : memref<8x128xf32, #tpu.memory_space<vmem>>, vector<8x128xf32>
    %265 = arith.mulf %255, %264 : vector<8x128xf32>
    %266 = arith.mulf %249, %257 : vector<8x128xf32>
    %267 = arith.addf %265, %266 : vector<8x128xf32>
    %268 = math.tanh %267 : vector<8x128xf32>
    %269 = arith.mulf %263, %268 : vector<8x128xf32>
    %c0_120 = arith.constant 0 : index
    %c0_121 = arith.constant 0 : index
    %270 = vector.load %arg5[%c0_120, %c0_121] : memref<8x128xf32, #tpu.memory_space<vmem>>, vector<8x128xf32>
    tpu.vector_store %arg5[%c0_120, %c0_121], %267 {strides = array<i32>} : memref<8x128xf32, #tpu.memory_space<vmem>>, vector<8x128xf32>,
    %c0_122 = arith.constant 0 : index
    %c0_123 = arith.constant 0 : index
    %271 = vector.load %arg4[%c0_122, %c0_123] : memref<8x128xf32, #tpu.memory_space<vmem>>, vector<8x128xf32>
    tpu.vector_store %arg4[%c0_122, %c0_123], %269 {strides = array<i32>} : memref<8x128xf32, #tpu.memory_space<vmem>>, vector<8x128xf32>,
    %272 = arith.index_cast %c6_i32 : i32 to index
    %c0_124 = arith.constant 0 : index
    %c0_125 = arith.constant 0 : index
    %273 = vector.load %arg3[%272, %c0_124, %c0_125] : memref<8x8x128xf32, #tpu.memory_space<vmem>>, vector<1x8x128xf32>
    %274 = vector.shape_cast %273 : vector<1x8x128xf32> to vector<8x128xf32>
    %275 = vector.shape_cast %269 : vector<8x128xf32> to vector<1x8x128xf32>
    tpu.vector_store %arg3[%272, %c0_124, %c0_125], %275 {strides = array<i32>} : memref<8x8x128xf32, #tpu.memory_space<vmem>>, vector<1x8x128xf32>,
    %c7_i32 = arith.constant 7 : i32
    %276 = arith.index_cast %c7_i32 : i32 to index
    %c0_126 = arith.constant 0 : index
    %c0_127 = arith.constant 0 : index
    %277 = vector.load %arg1[%276, %c0_126, %c0_127] : memref<8x8x512xf32, #tpu.memory_space<vmem>>, vector<1x8x512xf32>
    %278 = vector.shape_cast %277 : vector<1x8x512xf32> to vector<8x512xf32>
    %c0_128 = arith.constant 0 : index
    %c0_129 = arith.constant 0 : index
    %279 = vector.load %arg4[%c0_128, %c0_129] : memref<8x128xf32, #tpu.memory_space<vmem>>, vector<8x128xf32>
    %c0_130 = arith.constant 0 : index
    %c0_131 = arith.constant 0 : index
    %280 = vector.load %arg2[%c0_130, %c0_131] : memref<128x512xf32, #tpu.memory_space<vmem>>, vector<128x512xf32>
    %cst_132 = arith.constant dense<0.000000e+00> : vector<8x512xf32>
    %281 = tpu.matmul %279, %280, %cst_132 {dimension_numbers = #tpu.dot_dimension_numbers<[1], [0], [0], [1], [0, 0, 1, 1], [], []>} : vector<8x128xf32>, vector<128x512xf32>, vector<8x512xf32> -> vector<8x512xf32>
    %282 = arith.addf %278, %281 : vector<8x512xf32>
    %283 = vector.extract_strided_slice %282 {offsets = [0, 0], sizes = [8, 128], strides = [1, 1]} : vector<8x512xf32> to vector<8x128xf32>
    %284 = arith.negf %283 : vector<8x128xf32>
    %285 = math.exp %284 : vector<8x128xf32>
    %cst_133 = arith.constant 1.000000e+00 : f32
    %286 = vector.broadcast %cst_133 : f32 to vector<8x128xf32>
    %287 = arith.addf %286, %285 : vector<8x128xf32>
    %288 = arith.divf %286, %287 : vector<8x128xf32>
    %289 = vector.extract_strided_slice %282 {offsets = [0, 128], sizes = [8, 128], strides = [1, 1]} : vector<8x512xf32> to vector<8x128xf32>
    %290 = arith.negf %289 : vector<8x128xf32>
    %291 = math.exp %290 : vector<8x128xf32>
    %cst_134 = arith.constant 1.000000e+00 : f32
    %292 = vector.broadcast %cst_134 : f32 to vector<8x128xf32>
    %293 = arith.addf %292, %291 : vector<8x128xf32>
    %294 = arith.divf %292, %293 : vector<8x128xf32>
    %295 = vector.extract_strided_slice %282 {offsets = [0, 256], sizes = [8, 128], strides = [1, 1]} : vector<8x512xf32> to vector<8x128xf32>
    %296 = math.tanh %295 : vector<8x128xf32>
    %297 = vector.extract_strided_slice %282 {offsets = [0, 384], sizes = [8, 128], strides = [1, 1]} : vector<8x512xf32> to vector<8x128xf32>
    %298 = arith.negf %297 : vector<8x128xf32>
    %299 = math.exp %298 : vector<8x128xf32>
    %cst_135 = arith.constant 1.000000e+00 : f32
    %300 = vector.broadcast %cst_135 : f32 to vector<8x128xf32>
    %301 = arith.addf %300, %299 : vector<8x128xf32>
    %302 = arith.divf %300, %301 : vector<8x128xf32>
    %c0_136 = arith.constant 0 : index
    %c0_137 = arith.constant 0 : index
    %303 = vector.load %arg5[%c0_136, %c0_137] : memref<8x128xf32, #tpu.memory_space<vmem>>, vector<8x128xf32>
    %304 = arith.mulf %294, %303 : vector<8x128xf32>
    %305 = arith.mulf %288, %296 : vector<8x128xf32>
    %306 = arith.addf %304, %305 : vector<8x128xf32>
    %307 = math.tanh %306 : vector<8x128xf32>
    %308 = arith.mulf %302, %307 : vector<8x128xf32>
    %c0_138 = arith.constant 0 : index
    %c0_139 = arith.constant 0 : index
    %309 = vector.load %arg5[%c0_138, %c0_139] : memref<8x128xf32, #tpu.memory_space<vmem>>, vector<8x128xf32>
    tpu.vector_store %arg5[%c0_138, %c0_139], %306 {strides = array<i32>} : memref<8x128xf32, #tpu.memory_space<vmem>>, vector<8x128xf32>,
    %c0_140 = arith.constant 0 : index
    %c0_141 = arith.constant 0 : index
    %310 = vector.load %arg4[%c0_140, %c0_141] : memref<8x128xf32, #tpu.memory_space<vmem>>, vector<8x128xf32>
    tpu.vector_store %arg4[%c0_140, %c0_141], %308 {strides = array<i32>} : memref<8x128xf32, #tpu.memory_space<vmem>>, vector<8x128xf32>,
    %311 = arith.index_cast %c7_i32 : i32 to index
    %c0_142 = arith.constant 0 : index
    %c0_143 = arith.constant 0 : index
    %312 = vector.load %arg3[%311, %c0_142, %c0_143] : memref<8x8x128xf32, #tpu.memory_space<vmem>>, vector<1x8x128xf32>
    %313 = vector.shape_cast %312 : vector<1x8x128xf32> to vector<8x128xf32>
    %314 = vector.shape_cast %308 : vector<8x128xf32> to vector<1x8x128xf32>
    tpu.vector_store %arg3[%311, %c0_142, %c0_143], %314 {strides = array<i32>} : memref<8x8x128xf32, #tpu.memory_space<vmem>>, vector<1x8x128xf32>,
    %c8_i32 = arith.constant 8 : i32
    return
  }
  func.func @transform_0(%arg0: i32) -> (i32, i32, i32) {
    %c0_i32 = arith.constant 0 : i32
    %c0_i32_0 = arith.constant 0 : i32
    %c0_i32_1 = arith.constant 0 : i32
    return %arg0, %c0_i32, %c0_i32_0 : i32, i32, i32
  }
  func.func @transform_1(%arg0: i32) -> (i32, i32) {
    %c0_i32 = arith.constant 0 : i32
    %c0_i32_0 = arith.constant 0 : i32
    %c0_i32_1 = arith.constant 0 : i32
    return %c0_i32, %c0_i32_0 : i32, i32
  }
  func.func @transform_2(%arg0: i32) -> (i32, i32, i32) {
    %c0_i32 = arith.constant 0 : i32
    %c0_i32_0 = arith.constant 0 : i32
    %c0_i32_1 = arith.constant 0 : i32
    return %arg0, %c0_i32, %c0_i32_0 : i32, i32, i32
  }
}

module attributes {stable_mosaic.version = 11 : i64} {
  func.func @_fc_kernel(%arg0: i32, %arg1: memref<8x8x128xf32, #tpu.memory_space<vmem>>, %arg2: memref<128x128xf32, #tpu.memory_space<vmem>>, %arg3: memref<1x128xf32, #tpu.memory_space<vmem>>, %arg4: memref<8x8x128xf32, #tpu.memory_space<vmem>>) attributes {dimension_semantics = [#tpu.dimension_semantics<parallel>], iteration_bounds = array<i64: 1>, scalar_prefetch = 0 : i64, scratch_operands = 0 : i64, tpu.core_type = #tpu.core_type<tc>, window_params = [{transform_indices = @transform_0, window_bounds = array<i64: 8, 8, 128>}, {pipeline_mode = #tpu.pipeline_mode<synchronous>, transform_indices = @transform_1, window_bounds = array<i64: 128, 128>}, {pipeline_mode = #tpu.pipeline_mode<synchronous>, transform_indices = @transform_2, window_bounds = array<i64: 1, 128>}, {transform_indices = @transform_3, window_bounds = array<i64: 8, 8, 128>}]} {
    %c0 = arith.constant 0 : index
    %c0_0 = arith.constant 0 : index
    %c0_1 = arith.constant 0 : index
    %0 = vector.load %arg1[%c0, %c0_0, %c0_1] : memref<8x8x128xf32, #tpu.memory_space<vmem>>, vector<8x8x128xf32>
    %1 = vector.shape_cast %0 : vector<8x8x128xf32> to vector<64x128xf32>
    %c0_2 = arith.constant 0 : index
    %c0_3 = arith.constant 0 : index
    %2 = vector.load %arg2[%c0_2, %c0_3] : memref<128x128xf32, #tpu.memory_space<vmem>>, vector<128x128xf32>
    %cst = arith.constant dense<0.000000e+00> : vector<64x128xf32>
    %3 = tpu.matmul %1, %2, %cst {dimension_numbers = #tpu.dot_dimension_numbers<[1], [0], [0], [1], [0, 0, 1, 1], [], []>} : vector<64x128xf32>, vector<128x128xf32>, vector<64x128xf32> -> vector<64x128xf32>
    %c0_4 = arith.constant 0 : index
    %c0_5 = arith.constant 0 : index
    %4 = vector.load %arg3[%c0_4, %c0_5] : memref<1x128xf32, #tpu.memory_space<vmem>>, vector<1x128xf32>
    %5 = vector.broadcast %4 : vector<1x128xf32> to vector<64x128xf32>
    %6 = arith.addf %3, %5 : vector<64x128xf32>
    %7 = vector.shape_cast %6 : vector<64x128xf32> to vector<8x8x128xf32>
    %c0_6 = arith.constant 0 : index
    %c0_7 = arith.constant 0 : index
    %c0_8 = arith.constant 0 : index
    %8 = vector.load %arg4[%c0_6, %c0_7, %c0_8] : memref<8x8x128xf32, #tpu.memory_space<vmem>>, vector<8x8x128xf32>
    tpu.vector_store %arg4[%c0_6, %c0_7, %c0_8], %7 {strides = array<i32>} : memref<8x8x128xf32, #tpu.memory_space<vmem>>, vector<8x8x128xf32>,
    return
  }
  func.func @transform_0(%arg0: i32) -> (i32, i32, i32) {
    %c0_i32 = arith.constant 0 : i32
    %c0_i32_0 = arith.constant 0 : i32
    %c0_i32_1 = arith.constant 0 : i32
    return %c0_i32, %arg0, %c0_i32_0 : i32, i32, i32
  }
  func.func @transform_1(%arg0: i32) -> (i32, i32) {
    %c0_i32 = arith.constant 0 : i32
    %c0_i32_0 = arith.constant 0 : i32
    %c0_i32_1 = arith.constant 0 : i32
    return %c0_i32, %c0_i32_0 : i32, i32
  }
  func.func @transform_2(%arg0: i32) -> (i32, i32) {
    %c0_i32 = arith.constant 0 : i32
    %c0_i32_0 = arith.constant 0 : i32
    %c0_i32_1 = arith.constant 0 : i32
    return %c0_i32, %c0_i32_0 : i32, i32
  }
  func.func @transform_3(%arg0: i32) -> (i32, i32, i32) {
    %c0_i32 = arith.constant 0 : i32
    %c0_i32_0 = arith.constant 0 : i32
    %c0_i32_1 = arith.constant 0 : i32
    return %c0_i32, %arg0, %c0_i32_0 : i32, i32, i32
  }
}

</mosaic_0001>

<bundles_post_ra>
// kernel: type_predictor_forward.3
= control target key start
LH: loop header
LB: loop body
LE: loop exit
PB: predicated region body
PF: predicated region fallthrough
CT: control target
= control target key end

     0   :  { %v380_v3 = vmov 0.0   ;;  %vm60_vm0 = vcmask 261120   ;;  %v40_v33 = vlaneseq  ;;  %s644_s1 = inlined_call_operand.vmem [shape: f32[32,512], index: 1, kind: input, shape index: {}]   ;;  %s645_s0 = inlined_call_operand.vmem [shape: f32[8,8,32], index: 0, kind: input, shape index: {}]   ;;  %s646_s2 = inlined_call_operand.vmem [shape: f32[1,512], index: 2, kind: input, shape index: {}]   ;;  %s647_s3 = inlined_call_operand.vmem [shape: f32[8,8,512], index: 3, kind: output, shape index: {}]  }
   0x1   :  { %v23_v0 = vld [vmem:[%s644_s1 + $0x8] sm:$0xff]  ;;  %v25_v2 = vld [vmem:[%s644_s1 + $0x18] sm:$0xff]  ;;  %149 = vmatprep.mubr.f32.mxu0 %v380_v3  ;;  %262 = vmatprep.mubr.f32.mxu1 %v380_v3  ;;  %v22_v6 = vld [vmem:[%s644_s1] sm:$0xff] }
   0x2   :  { %v27_v1 = vld [vmem:[%s644_s1 + $0x28] sm:$0xff]  ;;  %v29_v5 = vld [vmem:[%s644_s1 + $0x38] sm:$0xff]  ;;  %v26_v7 = vld [vmem:[%s644_s1 + $0x20] sm:$0xff]  ;;  %v41_v34 = vshrl.u32 %v40_v33, 7 }
   0x3   :  { %v363_v4 = vpack.c.bf16 %v27_v1, %v23_v0  ;;  %v371_v8 = vpack.c.bf16 %v29_v5, %v25_v2  ;;  %v365_v9 = vpack.c.bf16 %v26_v7, %v22_v6  ;;  %v24_v10 = vld [vmem:[%s644_s1 + $0x10] sm:$0xff]  ;;  %v31_v12 = vld [vmem:[%s644_s1 + $0x48] sm:$0xff]  ;;  %v33_v15 = vld [vmem:[%s644_s1 + $0x58] sm:$0xff] }
   0x4   :  { %v28_v11 = vld [vmem:[%s644_s1 + $0x30] sm:$0xff]  ;;  %v35_v14 = vld [vmem:[%s644_s1 + $0x68] sm:$0xff]  ;;  %v37_v16 = vld [vmem:[%s644_s1 + $0x78] sm:$0xff]  ;;  %v42_v35 = vsub.s32 0, %v41_v34  ;;  %v50_v37 = vsub.s32 2, %v41_v34  ;;  %v46_v38 = vsub.s32 1, %v41_v34 }
   0x5   :  { %364 = vmatprep.subr.bf16.mxu0 %v363_v4  ;;  %v373_v13 = vpack.c.bf16 %v28_v11, %v24_v10  ;;  %372 = vmatprep.subr.bf16.mxu1 %v371_v8  ;;  %v367_v17 = vpack.c.bf16 %v35_v14, %v31_v12  ;;  %v375_v18 = vpack.c.bf16 %v37_v16, %v33_v15  ;;  %v30_v19 = vld [vmem:[%s644_s1 + $0x40] sm:$0xff]  ;;  %v32_v21 = vld [vmem:[%s644_s1 + $0x50] sm:$0xff]  ;;  %v15_v26 = vld [vmem:[%s645_s0 + $0x8] sm:$0xff]  ;;  %v54_v39 = vsub.s32 3, %v41_v34 }
   0x6   :  { %366 = vmatpush1.bf16.msra.mxu0 %v365_v9  ;;  %v34_v20 = vld [vmem:[%s644_s1 + $0x60] sm:$0xff]  ;;  %v36_v23 = vld [vmem:[%s644_s1 + $0x70] sm:$0xff]  ;;  %v17_v28 = vld [vmem:[%s645_s0 + $0x18] sm:$0xff] }
   0x7   :  { %374 = vmatpush1.bf16.msra.mxu1 %v373_v13  ;;  %v369_v22 = vpack.c.bf16 %v34_v20, %v30_v19  ;;  %368 = vmatprep.subr.bf16.mxu0 %v367_v17  ;;  %v377_v24 = vpack.c.bf16 %v36_v23, %v32_v21  ;;  %v14_v25 = vld [vmem:[%s645_s0] sm:$0xff]  ;;  %v16_v27 = vld [vmem:[%s645_s0 + $0x10] sm:$0xff]  ;;  %v19_v30 = vld [vmem:[%s645_s0 + $0x28] sm:$0xff] }
   0x8   :  { %376 = vmatprep.subr.bf16.mxu1 %v375_v18  ;;  %v18_v29 = vld [vmem:[%s645_s0 + $0x20] sm:$0xff]  ;;  %v20_v31 = vld [vmem:[%s645_s0 + $0x30] sm:$0xff]  ;;  %v21_v32 = vld [vmem:[%s645_s0 + $0x38] sm:$0xff] }
   0x9   :  { %v38_v36 = vld [vmem:[%s646_s2] sm:$0xf] }
   0xa   :  { %370 = vmatpush1.bf16.msra.mxu0 %v369_v22  ;;  %v508_v40 = vrot.slane %v38_v36, %v42_v35  ;;  %v510_v41 = vrot.slane %v38_v36, %v50_v37  ;;  %v512_v42 = vrot.slane %v38_v36, %v46_v38  ;;  %v514_v43 = vrot.slane %v38_v36, %v54_v39 }
   0xb   :  { %378 = vmatpush1.bf16.msra.mxu1 %v377_v24 }
   0xd   :  { %347 = vmatmul.mubr.msk.f32.vlgmr.msra.gmra.mrb[0].mxu0 %vm60_vm0, %v14_v25 }
   0xe   :  { %355 = vmatmul.mubr.msk.f32.vlgmr.msra.gmra.mrb[0].mxu1 %vm60_vm0, %v14_v25  ;;  %155 = vmatprep.mubr.f32.mxu0 %v380_v3 }
   0xf   :  { %268 = vmatprep.mubr.f32.mxu1 %v380_v3 }
  0x11   :  { %348 = vmatmul.mubr.msk.f32.gmra.mrb[2].mxu0 %vm60_vm0, %v15_v26 }
  0x12   :  { %356 = vmatmul.mubr.msk.f32.gmra.mrb[2].mxu1 %vm60_vm0, %v15_v26  ;;  %161 = vmatprep.mubr.f32.mxu0 %v380_v3 }
  0x13   :  { %274 = vmatprep.mubr.f32.mxu1 %v380_v3 }
  0x15   :  { %349 = vmatmul.mubr.msk.f32.gmra.mrb[4].mxu0 %vm60_vm0, %v16_v27 }
  0x16   :  { %357 = vmatmul.mubr.msk.f32.gmra.mrb[4].mxu1 %vm60_vm0, %v16_v27  ;;  %167 = vmatprep.mubr.f32.mxu0 %v380_v3 }
  0x17   :  { %280 = vmatprep.mubr.f32.mxu1 %v380_v3 }
  0x19   :  { %350 = vmatmul.mubr.msk.f32.gmra.mrb[6].mxu0 %vm60_vm0, %v17_v28 }
  0x1a   :  { %358 = vmatmul.mubr.msk.f32.gmra.mrb[6].mxu1 %vm60_vm0, %v17_v28  ;;  %173 = vmatprep.mubr.f32.mxu0 %v380_v3 }
  0x1b   :  { %286 = vmatprep.mubr.f32.mxu1 %v380_v3 }
  0x1d   :  { %351 = vmatmul.mubr.msk.f32.gmra.mrb[8].mxu0 %vm60_vm0, %v18_v29 }
  0x1e   :  { %359 = vmatmul.mubr.msk.f32.gmra.mrb[8].mxu1 %vm60_vm0, %v18_v29  ;;  %179 = vmatprep.mubr.f32.mxu0 %v380_v3 }
  0x1f   :  { %292 = vmatprep.mubr.f32.mxu1 %v380_v3 }
  0x21   :  { %352 = vmatmul.mubr.msk.f32.gmra.mrb[10].mxu0 %vm60_vm0, %v19_v30 }
  0x22   :  { %360 = vmatmul.mubr.msk.f32.gmra.mrb[10].mxu1 %vm60_vm0, %v19_v30  ;;  %185 = vmatprep.mubr.f32.mxu0 %v380_v3 }
  0x23   :  { %298 = vmatprep.mubr.f32.mxu1 %v380_v3 }
  0x25   :  { %353 = vmatmul.mubr.msk.f32.gmra.mrb[12].mxu0 %vm60_vm0, %v20_v31 }
  0x26   :  { %361 = vmatmul.mubr.msk.f32.gmra.mrb[12].mxu1 %vm60_vm0, %v20_v31  ;;  %191 = vmatprep.mubr.f32.mxu0 %v380_v3 }
  0x27   :  { %304 = vmatprep.mubr.f32.mxu1 %v380_v3 }
  0x29   :  { %354 = vmatmul.mubr.msk.f32.gmra.mrb[14].mxu0 %vm60_vm0, %v21_v32 }
  0x2a   :  { %362 = vmatmul.mubr.msk.f32.gmra.mrb[14].mxu1 %vm60_vm0, %v21_v32 }
  0xe0   :  { %v151_v44 = vpop.f32.mrb[0].mxu0 }
  0xe1   :  { %v152_v45 = vadd.f32 %v151_v44, %v508_v40  ;;  %v264_v46 = vpop.f32.mrb[0].mxu1  ;;  %v153_v47 = vpop.f32.mrb[1].mxu0 }
  0xe2   :  { %v265_v48 = vadd.f32 %v264_v46, %v510_v41  ;;  %v154_v49 = vadd.f32 %v153_v47, %v512_v42  ;;  %v266_v50 = vpop.f32.mrb[1].mxu1 }
  0xe3   :  { %311 = vst [vmem:[%s647_s3] sm:$0xff] %v152_v45  ;;  %v267_v51 = vadd.f32 %v266_v50, %v514_v43 }
  0xe4   :  { %313 = vst [vmem:[%s647_s3 + $0x10] sm:$0xff] %v265_v48  ;;  %312 = vst [vmem:[%s647_s3 + $0x8] sm:$0xff] %v154_v49  ;;  %v157_v52 = vpop.f32.mrb[2].mxu0 }
  0xe5   :  { %314 = vst [vmem:[%s647_s3 + $0x18] sm:$0xff] %v267_v51  ;;  %v158_v53 = vadd.f32 %v157_v52, %v508_v40  ;;  %v270_v54 = vpop.f32.mrb[2].mxu1  ;;  %v159_v55 = vpop.f32.mrb[3].mxu0 }
  0xe6   :  { %v271_v56 = vadd.f32 %v270_v54, %v510_v41  ;;  %v160_v57 = vadd.f32 %v159_v55, %v512_v42  ;;  %v272_v58 = vpop.f32.mrb[3].mxu1 }
  0xe7   :  { %315 = vst [vmem:[%s647_s3 + $0x20] sm:$0xff] %v158_v53  ;;  %v273_v59 = vadd.f32 %v272_v58, %v514_v43 }
  0xe8   :  { %317 = vst [vmem:[%s647_s3 + $0x30] sm:$0xff] %v271_v56  ;;  %316 = vst [vmem:[%s647_s3 + $0x28] sm:$0xff] %v160_v57  ;;  %v163_v60 = vpop.f32.mrb[4].mxu0 }
  0xe9   :  { %318 = vst [vmem:[%s647_s3 + $0x38] sm:$0xff] %v273_v59  ;;  %v164_v61 = vadd.f32 %v163_v60, %v508_v40  ;;  %v276_v62 = vpop.f32.mrb[4].mxu1  ;;  %v165_v63 = vpop.f32.mrb[5].mxu0 }
  0xea   :  { %v277_v0 = vadd.f32 %v276_v62, %v510_v41  ;;  %v166_v1 = vadd.f32 %v165_v63, %v512_v42  ;;  %v278_v2 = vpop.f32.mrb[5].mxu1 }
  0xeb   :  { %319 = vst [vmem:[%s647_s3 + $0x40] sm:$0xff] %v164_v61  ;;  %v279_v3 = vadd.f32 %v278_v2, %v514_v43 }
  0xec   :  { %321 = vst [vmem:[%s647_s3 + $0x50] sm:$0xff] %v277_v0  ;;  %320 = vst [vmem:[%s647_s3 + $0x48] sm:$0xff] %v166_v1  ;;  %v169_v4 = vpop.f32.mrb[6].mxu0 }
  0xed   :  { %322 = vst [vmem:[%s647_s3 + $0x58] sm:$0xff] %v279_v3  ;;  %v170_v5 = vadd.f32 %v169_v4, %v508_v40  ;;  %v282_v6 = vpop.f32.mrb[6].mxu1  ;;  %v171_v7 = vpop.f32.mrb[7].mxu0 }
  0xee   :  { %v283_v8 = vadd.f32 %v282_v6, %v510_v41  ;;  %v172_v9 = vadd.f32 %v171_v7, %v512_v42  ;;  %v284_v10 = vpop.f32.mrb[7].mxu1 }
  0xef   :  { %323 = vst [vmem:[%s647_s3 + $0x60] sm:$0xff] %v170_v5  ;;  %v285_v11 = vadd.f32 %v284_v10, %v514_v43 }
  0xf0   :  { %325 = vst [vmem:[%s647_s3 + $0x70] sm:$0xff] %v283_v8  ;;  %324 = vst [vmem:[%s647_s3 + $0x68] sm:$0xff] %v172_v9  ;;  %v175_v12 = vpop.f32.mrb[8].mxu0 }
  0xf1   :  { %326 = vst [vmem:[%s647_s3 + $0x78] sm:$0xff] %v285_v11  ;;  %v176_v13 = vadd.f32 %v175_v12, %v508_v40  ;;  %v288_v14 = vpop.f32.mrb[8].mxu1  ;;  %v177_v15 = vpop.f32.mrb[9].mxu0 }
  0xf2   :  { %v289_v16 = vadd.f32 %v288_v14, %v510_v41  ;;  %v178_v17 = vadd.f32 %v177_v15, %v512_v42  ;;  %v290_v18 = vpop.f32.mrb[9].mxu1 }
  0xf3   :  { %327 = vst [vmem:[%s647_s3 + $0x80] sm:$0xff] %v176_v13  ;;  %v291_v19 = vadd.f32 %v290_v18, %v514_v43 }
  0xf4   :  { %329 = vst [vmem:[%s647_s3 + $0x90] sm:$0xff] %v289_v16  ;;  %328 = vst [vmem:[%s647_s3 + $0x88] sm:$0xff] %v178_v17  ;;  %v181_v20 = vpop.f32.mrb[10].mxu0 }
  0xf5   :  { %330 = vst [vmem:[%s647_s3 + $0x98] sm:$0xff] %v291_v19  ;;  %v182_v21 = vadd.f32 %v181_v20, %v508_v40  ;;  %v294_v22 = vpop.f32.mrb[10].mxu1  ;;  %v183_v23 = vpop.f32.mrb[11].mxu0 }
  0xf6   :  { %v295_v24 = vadd.f32 %v294_v22, %v510_v41  ;;  %v184_v25 = vadd.f32 %v183_v23, %v512_v42  ;;  %v296_v26 = vpop.f32.mrb[11].mxu1 }
  0xf7   :  { %331 = vst [vmem:[%s647_s3 + $0xa0] sm:$0xff] %v182_v21  ;;  %v297_v27 = vadd.f32 %v296_v26, %v514_v43 }
  0xf8   :  { %333 = vst [vmem:[%s647_s3 + $0xb0] sm:$0xff] %v295_v24  ;;  %332 = vst [vmem:[%s647_s3 + $0xa8] sm:$0xff] %v184_v25  ;;  %v187_v28 = vpop.f32.mrb[12].mxu0 }
  0xf9   :  { %334 = vst [vmem:[%s647_s3 + $0xb8] sm:$0xff] %v297_v27  ;;  %v188_v29 = vadd.f32 %v187_v28, %v508_v40  ;;  %v300_v30 = vpop.f32.mrb[12].mxu1  ;;  %v189_v31 = vpop.f32.mrb[13].mxu0 }
  0xfa   :  { %v301_v32 = vadd.f32 %v300_v30, %v510_v41  ;;  %v190_v33 = vadd.f32 %v189_v31, %v512_v42  ;;  %v302_v34 = vpop.f32.mrb[13].mxu1 }
  0xfb   :  { %335 = vst [vmem:[%s647_s3 + $0xc0] sm:$0xff] %v188_v29  ;;  %v303_v35 = vadd.f32 %v302_v34, %v514_v43 }
  0xfc   :  { %337 = vst [vmem:[%s647_s3 + $0xd0] sm:$0xff] %v301_v32  ;;  %336 = vst [vmem:[%s647_s3 + $0xc8] sm:$0xff] %v190_v33  ;;  %v193_v36 = vpop.f32.mrb[14].mxu0 }
  0xfd   :  { %338 = vst [vmem:[%s647_s3 + $0xd8] sm:$0xff] %v303_v35  ;;  %v194_v37 = vadd.f32 %v193_v36, %v508_v40  ;;  %v306_v38 = vpop.f32.mrb[14].mxu1  ;;  %v195_v39 = vpop.f32.mrb[15].mxu0 }
  0xfe   :  { %v307_v44 = vadd.f32 %v306_v38, %v510_v41  ;;  %v196_v45 = vadd.f32 %v195_v39, %v512_v42  ;;  %v308_v46 = vpop.f32.mrb[15].mxu1 }
  0xff   :  { %339 = vst [vmem:[%s647_s3 + $0xe0] sm:$0xff] %v194_v37  ;;  %v309_v47 = vadd.f32 %v308_v46, %v514_v43 }
 0x100   :  { %341 = vst [vmem:[%s647_s3 + $0xf0] sm:$0xff] %v307_v44  ;;  %340 = vst [vmem:[%s647_s3 + $0xe8] sm:$0xff] %v196_v45 }
 0x101   :  { %342 = vst [vmem:[%s647_s3 + $0xf8] sm:$0xff] %v309_v47 }

// kernel: type_predictor_forward.5
= control target key start
LH: loop header
LB: loop body
LE: loop exit
PB: predicated region body
PF: predicated region fallthrough
CT: control target
= control target key end

     0   :  { %s398_s1 = inlined_call_operand.vmem [shape: f32[128,128], index: 1, kind: input, shape index: {}]   ;;  %s399_s0 = inlined_call_operand.vmem [shape: f32[8,8,128], index: 0, kind: input, shape index: {}]   ;;  %s400_s2 = inlined_call_operand.vmem [shape: f32[1,128], index: 2, kind: input, shape index: {}]   ;;  %s401_s3 = inlined_call_operand.vmem [shape: f32[8,8,128], index: 3, kind: output, shape index: {}]  }
   0x1   :  { %v22_v0 = vld [vmem:[%s398_s1] sm:$0xff]  ;;  %v23_v1 = vld [vmem:[%s398_s1 + $0x8] sm:$0xff]  ;;  %v24_v2 = vld [vmem:[%s398_s1 + $0x10] sm:$0xff] }
   0x2   :  { %v231_v3 = vpack.c.bf16 %v23_v1, %v22_v0  ;;  %v25_v4 = vld [vmem:[%s398_s1 + $0x18] sm:$0xff]  ;;  %v26_v6 = vld [vmem:[%s398_s1 + $0x20] sm:$0xff]  ;;  %v27_v7 = vld [vmem:[%s398_s1 + $0x28] sm:$0xff] }
   0x3   :  { %v235_v5 = vpack.c.bf16 %v25_v4, %v24_v2  ;;  %v239_v8 = vpack.c.bf16 %v27_v7, %v26_v6  ;;  %v14_v9 = vld [vmem:[%s399_s0] sm:$0xff]  ;;  %v28_v11 = vld [vmem:[%s398_s1 + $0x30] sm:$0xff]  ;;  %v29_v12 = vld [vmem:[%s398_s1 + $0x38] sm:$0xff] }
   0x4   :  { %232 = vmatprep.subr.bf16.mxu0 %v231_v3  ;;  %263 = vmatprep.subr.bf16.mxu1 %v231_v3  ;;  %v18_v10 = vld [vmem:[%s399_s0 + $0x20] sm:$0xff]  ;;  %v243_v13 = vpack.c.bf16 %v29_v12, %v28_v11  ;;  %v31_v15 = vld [vmem:[%s398_s1 + $0x48] sm:$0xff]  ;;  %v32_v17 = vld [vmem:[%s398_s1 + $0x50] sm:$0xff] }
   0x5   :  { %234 = vmatpush3.bf16.msra.mxu0 %v231_v3  ;;  %271 = vmatpush3.bf16.msra.mxu1 %v231_v3  ;;  %v30_v14 = vld [vmem:[%s398_s1 + $0x40] sm:$0xff]  ;;  %v33_v18 = vld [vmem:[%s398_s1 + $0x58] sm:$0xff]  ;;  %v35_v21 = vld [vmem:[%s398_s1 + $0x68] sm:$0xff] }
   0x6   :  { %236 = vmatprep.subr.bf16.mxu0 %v235_v5  ;;  %264 = vmatprep.subr.bf16.mxu1 %v235_v5  ;;  %v247_v16 = vpack.c.bf16 %v31_v15, %v30_v14  ;;  %v251_v19 = vpack.c.bf16 %v33_v18, %v32_v17  ;;  %v34_v20 = vld [vmem:[%s398_s1 + $0x60] sm:$0xff]  ;;  %v36_v23 = vld [vmem:[%s398_s1 + $0x70] sm:$0xff]  ;;  %v37_v24 = vld [vmem:[%s398_s1 + $0x78] sm:$0xff] }
   0x7   :  { %219 = vmatprep.mubr.f32.mxu0 %v14_v9  ;;  %225 = vmatprep.mubr.f32.mxu1 %v18_v10  ;;  %v255_v22 = vpack.c.bf16 %v35_v21, %v34_v20  ;;  %v259_v25 = vpack.c.bf16 %v37_v24, %v36_v23  ;;  %v15_v26 = vld [vmem:[%s399_s0 + $0x8] sm:$0xff]  ;;  %v16_v28 = vld [vmem:[%s399_s0 + $0x10] sm:$0xff]  ;;  %v17_v30 = vld [vmem:[%s399_s0 + $0x18] sm:$0xff] }
   0x8   :  { %v19_v27 = vld [vmem:[%s399_s0 + $0x28] sm:$0xff]  ;;  %v20_v29 = vld [vmem:[%s399_s0 + $0x30] sm:$0xff]  ;;  %v21_v31 = vld [vmem:[%s399_s0 + $0x38] sm:$0xff] }
   0x9   :  { %238 = vmatpush3.bf16.msra.mxu0 %v235_v5  ;;  %272 = vmatpush3.bf16.msra.mxu1 %v235_v5  ;;  %v162_v32 = vld [vmem:[%s400_s2] ss:$0 sm:$0xff] }
   0xa   :  { %240 = vmatprep.subr.bf16.mxu0 %v239_v8  ;;  %265 = vmatprep.subr.bf16.mxu1 %v239_v8 }
   0xd   :  { %242 = vmatpush3.bf16.msra.mxu0 %v239_v8  ;;  %273 = vmatpush3.bf16.msra.mxu1 %v239_v8 }
   0xe   :  { %244 = vmatprep.subr.bf16.mxu0 %v243_v13  ;;  %266 = vmatprep.subr.bf16.mxu1 %v243_v13 }
  0x11   :  { %246 = vmatpush3.bf16.msra.mxu0 %v243_v13  ;;  %274 = vmatpush3.bf16.msra.mxu1 %v243_v13 }
  0x12   :  { %248 = vmatprep.subr.bf16.mxu0 %v247_v16  ;;  %267 = vmatprep.subr.bf16.mxu1 %v247_v16 }
  0x15   :  { %250 = vmatpush3.bf16.msra.mxu0 %v247_v16  ;;  %275 = vmatpush3.bf16.msra.mxu1 %v247_v16 }
  0x16   :  { %252 = vmatprep.subr.bf16.mxu0 %v251_v19  ;;  %268 = vmatprep.subr.bf16.mxu1 %v251_v19 }
  0x19   :  { %254 = vmatpush3.bf16.msra.mxu0 %v251_v19  ;;  %276 = vmatpush3.bf16.msra.mxu1 %v251_v19 }
  0x1a   :  { %256 = vmatprep.subr.bf16.mxu0 %v255_v22  ;;  %269 = vmatprep.subr.bf16.mxu1 %v255_v22 }
  0x1d   :  { %258 = vmatpush3.bf16.msra.mxu0 %v255_v22  ;;  %277 = vmatpush3.bf16.msra.mxu1 %v255_v22 }
  0x1e   :  { %260 = vmatprep.subr.bf16.mxu0 %v259_v25  ;;  %270 = vmatprep.subr.bf16.mxu1 %v259_v25 }
  0x21   :  { %262 = vmatpush3.bf16.msra.mxu0 %v259_v25  ;;  %278 = vmatpush3.bf16.msra.mxu1 %v259_v25 }
  0x24   :  { %220 = vmatmul.mubr.f32.vlgmr.msra.gmra.mrb[0].mxu0 %v15_v26  ;;  %226 = vmatmul.mubr.f32.vlgmr.msra.gmra.mrb[0].mxu1 %v19_v27 }
  0x25   :  { %222 = vmatprep.mubr.f32.mxu0 %v16_v28  ;;  %228 = vmatprep.mubr.f32.mxu1 %v20_v29 }
  0x28   :  { %223 = vmatmul.mubr.f32.gmra.mrb[2].mxu0 %v17_v30  ;;  %229 = vmatmul.mubr.f32.gmra.mrb[2].mxu1 %v21_v31 }
  0xf7   :  { %v221_v33 = vpop.f32.mrb[0].mxu0  ;;  %v227_v34 = vpop.f32.mrb[0].mxu1 }
  0xf8   :  { %v117_v35 = vadd.f32 %v221_v33, %v162_v32  ;;  %v137_v36 = vadd.f32 %v227_v34, %v162_v32  ;;  %v111_v37 = vpop.f32.mrb[1].mxu0  ;;  %v131_v38 = vpop.f32.mrb[1].mxu1 }
  0xf9   :  { %v112_v39 = vadd.f32 %v162_v32, %v111_v37  ;;  %v132_v40 = vadd.f32 %v162_v32, %v131_v38 }
  0xfa   :  { %151 = vst [vmem:[%s401_s3 + $0x8] sm:$0xff] %v117_v35  ;;  %155 = vst [vmem:[%s401_s3 + $0x28] sm:$0xff] %v137_v36 }
  0xfb   :  { %150 = vst [vmem:[%s401_s3] sm:$0xff] %v112_v39  ;;  %154 = vst [vmem:[%s401_s3 + $0x20] sm:$0xff] %v132_v40  ;;  %v224_v41 = vpop.f32.mrb[2].mxu0  ;;  %v230_v42 = vpop.f32.mrb[2].mxu1 }
  0xfc   :  { %v127_v43 = vadd.f32 %v224_v41, %v162_v32  ;;  %v147_v44 = vadd.f32 %v230_v42, %v162_v32  ;;  %v121_v45 = vpop.f32.mrb[3].mxu0  ;;  %v141_v46 = vpop.f32.mrb[3].mxu1 }
  0xfd   :  { %v122_v47 = vadd.f32 %v162_v32, %v121_v45  ;;  %v142_v48 = vadd.f32 %v162_v32, %v141_v46 }
  0xfe   :  { %153 = vst [vmem:[%s401_s3 + $0x18] sm:$0xff] %v127_v43  ;;  %157 = vst [vmem:[%s401_s3 + $0x38] sm:$0xff] %v147_v44 }
  0xff   :  { %152 = vst [vmem:[%s401_s3 + $0x10] sm:$0xff] %v122_v47  ;;  %156 = vst [vmem:[%s401_s3 + $0x30] sm:$0xff] %v142_v48 }

// kernel: type_predictor_forward.4
= control target key start
LH: loop header
LB: loop body
LE: loop exit
PB: predicated region body
PF: predicated region fallthrough
CT: control target
= control target key end

     0   :  { %v2679_v3 = vmov 0.0   ;;  %s3675_s1 = inlined_call_operand.vmem [shape: f32[128,512], index: 1, kind: input, shape index: {}]   ;;  %s3676_s0 = inlined_call_operand.vmem [shape: f32[8,8,512], index: 0, kind: input, shape index: {}]   ;;  %s3677_s2 = inlined_call_operand.vmem [shape: f32[8,8,128], index: 2, kind: output, shape index: {}]  }
   0x1   :  { %v23_v0 = vld [vmem:[%s3675_s1 + $0x8] sm:$0xff]  ;;  %v22_v2 = vld [vmem:[%s3675_s1] sm:$0xff]  ;;  %150 = vmatprep.mubr.f32.mxu0 %v2679_v3  ;;  %221 = vmatprep.mubr.f32.mxu1 %v2679_v3  ;;  %v25_v19 = vld [vmem:[%s3675_s1 + $0x18] sm:$0xff] }
   0x2   :  { %v27_v1 = vld [vmem:[%s3675_s1 + $0x28] sm:$0xff]  ;;  %v26_v5 = vld [vmem:[%s3675_s1 + $0x20] sm:$0xff]  ;;  %v29_v20 = vld [vmem:[%s3675_s1 + $0x38] sm:$0xff] }
   0x3   :  { %v2706_v4 = vpack.c.bf16 %v27_v1, %v23_v0  ;;  %v31_v6 = vld [vmem:[%s3675_s1 + $0x48] sm:$0xff]  ;;  %v2717_v8 = vpack.c.bf16 %v26_v5, %v22_v2  ;;  %v30_v10 = vld [vmem:[%s3675_s1 + $0x40] sm:$0xff]  ;;  %v2758_v22 = vpack.c.bf16 %v29_v20, %v25_v19  ;;  %v24_v23 = vld [vmem:[%s3675_s1 + $0x10] sm:$0xff] }
   0x4   :  { %v35_v7 = vld [vmem:[%s3675_s1 + $0x68] sm:$0xff]  ;;  %v34_v11 = vld [vmem:[%s3675_s1 + $0x60] sm:$0xff]  ;;  %v28_v24 = vld [vmem:[%s3675_s1 + $0x30] sm:$0xff] }
   0x5   :  { %v2719_v9 = vpack.c.bf16 %v35_v7, %v31_v6  ;;  %v39_v12 = vld [vmem:[%s3675_s1 + $0x88] sm:$0xff]  ;;  %2039 = vmatprep.subr.bf16.mxu0 %v2706_v4  ;;  %v2735_v14 = vpack.c.bf16 %v34_v11, %v30_v10  ;;  %v38_v15 = vld [vmem:[%s3675_s1 + $0x80] sm:$0xff]  ;;  %v2766_v25 = vpack.c.bf16 %v28_v24, %v24_v23  ;;  %2071 = vmatprep.subr.bf16.mxu1 %v2758_v22  ;;  %v33_v27 = vld [vmem:[%s3675_s1 + $0x58] sm:$0xff] }
   0x6   :  { %v43_v13 = vld [vmem:[%s3675_s1 + $0xa8] sm:$0xff]  ;;  %2041 = vmatpush1.bf16.msra.mxu0 %v2717_v8  ;;  %v42_v16 = vld [vmem:[%s3675_s1 + $0xa0] sm:$0xff]  ;;  %v37_v28 = vld [vmem:[%s3675_s1 + $0x78] sm:$0xff] }
   0x7   :  { %2043 = vmatprep.subr.bf16.mxu0 %v2719_v9  ;;  %v2744_v17 = vpack.c.bf16 %v43_v13, %v39_v12  ;;  %v47_v18 = vld [vmem:[%s3675_s1 + $0xc8] sm:$0xff]  ;;  %v2769_v26 = vpack.c.bf16 %v42_v16, %v38_v15  ;;  %v32_v29 = vld [vmem:[%s3675_s1 + $0x50] sm:$0xff]  ;;  %v46_v31 = vld [vmem:[%s3675_s1 + $0xc0] sm:$0xff]  ;;  %2073 = vmatpush1.bf16.msra.mxu1 %v2766_v25  ;;  %v2791_v33 = vpack.c.bf16 %v37_v28, %v33_v27 }
   0x8   :  { %v51_v21 = vld [vmem:[%s3675_s1 + $0xe8] sm:$0xff]  ;;  %v50_v32 = vld [vmem:[%s3675_s1 + $0xe0] sm:$0xff]  ;;  %v36_v34 = vld [vmem:[%s3675_s1 + $0x70] sm:$0xff] }
   0x9   :  { %v2782_v30 = vpack.c.bf16 %v51_v21, %v47_v18  ;;  %v55_v35 = vld [vmem:[%s3675_s1 + $0x108] sm:$0xff]  ;;  %v2802_v37 = vpack.c.bf16 %v36_v34, %v32_v29  ;;  %v41_v38 = vld [vmem:[%s3675_s1 + $0x98] sm:$0xff]  ;;  %2075 = vmatprep.subr.bf16.mxu1 %v2791_v33  ;;  %v40_v40 = vld [vmem:[%s3675_s1 + $0x90] sm:$0xff]  ;;  %v2818_v42 = vpack.c.bf16 %v50_v32, %v46_v31 }
   0xa   :  { %2045 = vmatpush1.bf16.msra.mxu0 %v2735_v14  ;;  %v59_v36 = vld [vmem:[%s3675_s1 + $0x128] sm:$0xff]  ;;  %v45_v39 = vld [vmem:[%s3675_s1 + $0xb8] sm:$0xff]  ;;  %v44_v41 = vld [vmem:[%s3675_s1 + $0xb0] sm:$0xff] }
   0xb   :  { %2047 = vmatprep.subr.bf16.mxu0 %v2744_v17  ;;  %v54_v43 = vld [vmem:[%s3675_s1 + $0x100] sm:$0xff]  ;;  %v2826_v45 = vpack.c.bf16 %v45_v39, %v41_v38  ;;  %v2829_v46 = vpack.c.bf16 %v59_v36, %v55_v35  ;;  %2077 = vmatpush1.bf16.msra.mxu1 %v2802_v37  ;;  %v63_v47 = vld [vmem:[%s3675_s1 + $0x148] sm:$0xff]  ;;  %v2835_v48 = vpack.c.bf16 %v44_v41, %v40_v40  ;;  %v49_v49 = vld [vmem:[%s3675_s1 + $0xd8] sm:$0xff] }
   0xc   :  { %v58_v44 = vld [vmem:[%s3675_s1 + $0x120] sm:$0xff]  ;;  %v53_v50 = vld [vmem:[%s3675_s1 + $0xf8] sm:$0xff]  ;;  %v67_v51 = vld [vmem:[%s3675_s1 + $0x168] sm:$0xff] }
   0xd   :  { %2079 = vmatprep.subr.bf16.mxu1 %v2826_v45  ;;  %v2847_v52 = vpack.c.bf16 %v53_v50, %v49_v49  ;;  %v48_v53 = vld [vmem:[%s3675_s1 + $0xd0] sm:$0xff]  ;;  %v2856_v55 = vpack.c.bf16 %v58_v44, %v54_v43  ;;  %v57_v56 = vld [vmem:[%s3675_s1 + $0x118] sm:$0xff]  ;;  %v2865_v58 = vpack.c.bf16 %v67_v51, %v63_v47  ;;  %v62_v59 = vld [vmem:[%s3675_s1 + $0x140] sm:$0xff] }
   0xe   :  { %2049 = vmatpush1.bf16.msra.mxu0 %v2769_v26  ;;  %v52_v54 = vld [vmem:[%s3675_s1 + $0xf0] sm:$0xff]  ;;  %v61_v57 = vld [vmem:[%s3675_s1 + $0x138] sm:$0xff]  ;;  %v66_v60 = vld [vmem:[%s3675_s1 + $0x160] sm:$0xff] }
   0xf   :  { %2051 = vmatprep.subr.bf16.mxu0 %v2782_v30  ;;  %2081 = vmatpush1.bf16.msra.mxu1 %v2835_v48  ;;  %v71_v61 = vld [vmem:[%s3675_s1 + $0x188] sm:$0xff]  ;;  %v2877_v62 = vpack.c.bf16 %v52_v54, %v48_v53  ;;  %v2883_v0 = vpack.c.bf16 %v61_v57, %v57_v56  ;;  %v56_v1 = vld [vmem:[%s3675_s1 + $0x110] sm:$0xff]  ;;  %v65_v5 = vld [vmem:[%s3675_s1 + $0x158] sm:$0xff]  ;;  %v2898_v7 = vpack.c.bf16 %v66_v60, %v62_v59 }
  0x10   :  { %v75_v63 = vld [vmem:[%s3675_s1 + $0x1a8] sm:$0xff]  ;;  %2083 = vmatprep.subr.bf16.mxu1 %v2847_v52  ;;  %v60_v2 = vld [vmem:[%s3675_s1 + $0x130] sm:$0xff]  ;;  %v69_v6 = vld [vmem:[%s3675_s1 + $0x178] sm:$0xff] }
  0x11   :  { %v2901_v10 = vpack.c.bf16 %v75_v63, %v71_v61  ;;  %v70_v11 = vld [vmem:[%s3675_s1 + $0x180] sm:$0xff]  ;;  %v79_v13 = vld [vmem:[%s3675_s1 + $0x1c8] sm:$0xff]  ;;  %v2913_v15 = vpack.c.bf16 %v60_v2, %v56_v1  ;;  %v2919_v18 = vpack.c.bf16 %v69_v6, %v65_v5  ;;  %v64_v19 = vld [vmem:[%s3675_s1 + $0x150] sm:$0xff] }
  0x12   :  { %2053 = vmatpush1.bf16.msra.mxu0 %v2818_v42  ;;  %v74_v12 = vld [vmem:[%s3675_s1 + $0x1a0] sm:$0xff]  ;;  %v83_v16 = vld [vmem:[%s3675_s1 + $0x1e8] sm:$0xff]  ;;  %v68_v20 = vld [vmem:[%s3675_s1 + $0x170] sm:$0xff] }
  0x13   :  { %2055 = vmatprep.subr.bf16.mxu0 %v2829_v46  ;;  %2085 = vmatpush1.bf16.msra.mxu1 %v2877_v62  ;;  %v73_v21 = vld [vmem:[%s3675_s1 + $0x198] sm:$0xff]  ;;  %v2934_v24 = vpack.c.bf16 %v74_v12, %v70_v11  ;;  %v2937_v27 = vpack.c.bf16 %v83_v16, %v79_v13  ;;  %v78_v28 = vld [vmem:[%s3675_s1 + $0x1c0] sm:$0xff]  ;;  %v2946_v31 = vpack.c.bf16 %v68_v20, %v64_v19  ;;  %v72_v34 = vld [vmem:[%s3675_s1 + $0x190] sm:$0xff] }
  0x14   :  { %2087 = vmatprep.subr.bf16.mxu1 %v2883_v0  ;;  %v77_v23 = vld [vmem:[%s3675_s1 + $0x1b8] sm:$0xff]  ;;  %v82_v29 = vld [vmem:[%s3675_s1 + $0x1e0] sm:$0xff]  ;;  %v76_v35 = vld [vmem:[%s3675_s1 + $0x1b0] sm:$0xff] }
  0x15   :  { %v2949_v32 = vpack.c.bf16 %v77_v23, %v73_v21  ;;  %v81_v36 = vld [vmem:[%s3675_s1 + $0x1d8] sm:$0xff]  ;;  %v2964_v39 = vpack.c.bf16 %v82_v29, %v78_v28  ;;  %v2968_v40 = vpack.c.bf16 %v76_v35, %v72_v34  ;;  %v80_v43 = vld [vmem:[%s3675_s1 + $0x1d0] sm:$0xff]  ;;  %v17_v49 = vld [vmem:[%s3676_s0] sm:$0xff] }
  0x16   :  { %2057 = vmatpush1.bf16.msra.mxu0 %v2856_v55  ;;  %v85_v38 = vld [vmem:[%s3675_s1 + $0x1f8] sm:$0xff]  ;;  %v84_v44 = vld [vmem:[%s3675_s1 + $0x1f0] sm:$0xff]  ;;  %v18_v50 = vld [vmem:[%s3676_s0 + $0x8] sm:$0xff] }
  0x17   :  { %2059 = vmatprep.subr.bf16.mxu0 %v2865_v58  ;;  %2089 = vmatpush1.bf16.msra.mxu1 %v2913_v15  ;;  %v2971_v41 = vpack.c.bf16 %v85_v38, %v81_v36  ;;  %v2981_v47 = vpack.c.bf16 %v84_v44, %v80_v43  ;;  %v20_v60 = vld [vmem:[%s3676_s0 + $0x18] sm:$0xff]  ;;  %v19_v2 = vld [vmem:[%s3676_s0 + $0x10] sm:$0xff] }
  0x18   :  { %2091 = vmatprep.subr.bf16.mxu1 %v2919_v18  ;;  %v1984_v44 = vld [vmem:[%s3676_s0 + $0x30] sm:$0xff] }
  0x1a   :  { %2061 = vmatpush1.bf16.msra.mxu0 %v2898_v7 }
  0x1b   :  { %2063 = vmatprep.subr.bf16.mxu0 %v2901_v10  ;;  %2093 = vmatpush1.bf16.msra.mxu1 %v2946_v31 }
  0x1c   :  { %2095 = vmatprep.subr.bf16.mxu1 %v2949_v32 }
  0x1e   :  { %2065 = vmatpush1.bf16.msra.mxu0 %v2934_v24 }
  0x1f   :  { %2067 = vmatprep.subr.bf16.mxu0 %v2937_v27  ;;  %2097 = vmatpush1.bf16.msra.mxu1 %v2968_v40 }
  0x20   :  { %2099 = vmatprep.subr.bf16.mxu1 %v2971_v41 }
  0x22   :  { %2069 = vmatpush1.bf16.msra.mxu0 %v2964_v39 }
  0x23   :  { %2103 = vmatprep.subr.bf16.mxu0 %v2706_v4  ;;  %2101 = vmatpush1.bf16.msra.mxu1 %v2981_v47 }
  0x24   :  { %2135 = vmatprep.subr.bf16.mxu1 %v2758_v22 }
  0x25   :  { %151 = vmatmul.mubr.f32.vlgmr.msra.gmra.mrb[0].mxu0 %v2679_v3 }
  0x26   :  { %2105 = vmatpush1.bf16.msra.mxu0 %v2717_v8  ;;  %394 = vmatprep.mubr.f32.mxu0 %v2679_v3 }
  0x27   :  { %2107 = vmatprep.subr.bf16.mxu0 %v2719_v9  ;;  %222 = vmatmul.mubr.f32.vlgmr.msra.gmra.mrb[0].mxu1 %v2679_v3 }
  0x28   :  { %2137 = vmatpush1.bf16.msra.mxu1 %v2766_v25  ;;  %465 = vmatprep.mubr.f32.mxu1 %v2679_v3 }
  0x29   :  { %2139 = vmatprep.subr.bf16.mxu1 %v2791_v33 }
  0x2a   :  { %2109 = vmatpush1.bf16.msra.mxu0 %v2735_v14 }
  0x2b   :  { %2111 = vmatprep.subr.bf16.mxu0 %v2744_v17 }
  0x2c   :  { %2141 = vmatpush1.bf16.msra.mxu1 %v2802_v37 }
  0x2d   :  { %2143 = vmatprep.subr.bf16.mxu1 %v2826_v45 }
  0x2e   :  { %2113 = vmatpush1.bf16.msra.mxu0 %v2769_v26 }
  0x2f   :  { %2115 = vmatprep.subr.bf16.mxu0 %v2782_v30 }
  0x30   :  { %2145 = vmatpush1.bf16.msra.mxu1 %v2835_v48 }
  0x31   :  { %2147 = vmatprep.subr.bf16.mxu1 %v2847_v52 }
  0x32   :  { %2117 = vmatpush1.bf16.msra.mxu0 %v2818_v42 }
  0x33   :  { %2119 = vmatprep.subr.bf16.mxu0 %v2829_v46 }
  0x34   :  { %2149 = vmatpush1.bf16.msra.mxu1 %v2877_v62 }
  0x35   :  { %2151 = vmatprep.subr.bf16.mxu1 %v2883_v0 }
  0x36   :  { %2121 = vmatpush1.bf16.msra.mxu0 %v2856_v55 }
  0x37   :  { %2123 = vmatprep.subr.bf16.mxu0 %v2865_v58 }
  0x38   :  { %2153 = vmatpush1.bf16.msra.mxu1 %v2913_v15 }
  0x39   :  { %2155 = vmatprep.subr.bf16.mxu1 %v2919_v18 }
  0x3a   :  { %2125 = vmatpush1.bf16.msra.mxu0 %v2898_v7 }
  0x3b   :  { %2127 = vmatprep.subr.bf16.mxu0 %v2901_v10 }
  0x3c   :  { %2157 = vmatpush1.bf16.msra.mxu1 %v2946_v31 }
  0x3d   :  { %2159 = vmatprep.subr.bf16.mxu1 %v2949_v32 }
  0x3e   :  { %2129 = vmatpush1.bf16.msra.mxu0 %v2934_v24 }
  0x3f   :  { %2131 = vmatprep.subr.bf16.mxu0 %v2937_v27 }
  0x40   :  { %2161 = vmatpush1.bf16.msra.mxu1 %v2968_v40 }
  0x41   :  { %2163 = vmatprep.subr.bf16.mxu1 %v2971_v41 }
  0x42   :  { %2133 = vmatpush1.bf16.msra.mxu0 %v2964_v39 }
  0x43   :  { %2167 = vmatprep.subr.bf16.mxu0 %v2706_v4 }
  0x44   :  { %2165 = vmatpush1.bf16.msra.mxu1 %v2981_v47 }
  0x45   :  { %2199 = vmatprep.subr.bf16.mxu1 %v2758_v22 }
  0xf8   :  { %v152_v51 = vpop.f32.mrb[0].mxu0 }
  0xf9   :  { %v228_v53 = vadd.f32 %v152_v51, %v17_v49  ;;  %v154_v54 = vpop.f32.mrb[1].mxu0 }
  0xfa   :  { %v229_v56 = vadd.f32 %v154_v54, %v18_v50  ;;  %v223_v61 = vpop.f32.mrb[0].mxu1 }
  0xfb   :  { %v1979_v57 = vmul.f32 -1.442695, %v228_v53  ;;  %v225_v63 = vpop.f32.mrb[1].mxu1  ;;  %v230_v6 = vadd.f32 %v223_v61, %v19_v2 }
  0xfc   :  { %v1980_v59 = vmul.f32 -1.442695, %v229_v56  ;;  %v231_v1 = vadd.f32 %v225_v63, %v20_v60 }
  0xfd   :  { %2551 = vpow2.f32 %v1979_v57 }
  0xfe   :  { %2553 = vpow2.f32 %v1980_v59  ;;  %v1981_v5 = vmul.f32 -1.442695, %v231_v1 }
 0x100   :  { %2555 = vpow2.f32 %v1981_v5 }
 0x101   :  { %2557 = vtanh.f32 %v230_v6 }
 0x107   :  { %v2552_v11 = vpop.eup %2551 }
 0x108   :  { %v2554_v12 = vpop.eup %2553  ;;  %v235_v13 = vadd.f32 1.0, %v2552_v11 }
 0x109   :  { %v241_v16 = vadd.f32 1.0, %v2554_v12 }
 0x10a   :  { %2559 = vrcp.f32 %v235_v13  ;;  %v2556_v19 = vpop.eup %2555 }
 0x10b   :  { %2561 = vrcp.f32 %v241_v16  ;;  %v2558_v20 = vpop.eup %2557  ;;  %v248_v23 = vadd.f32 1.0, %v2556_v19  ;;  %v804_v16 = vld [vmem:[%s3675_s1 + $0x180] sm:$0xff] }
 0x10c   :  { %v808_v19 = vld [vmem:[%s3675_s1 + $0x1a0] sm:$0xff] }
 0x10d   :  { %2563 = vrcp.f32 %v248_v23  ;;  %v3190_v23 = vpack.c.bf16 %v808_v19, %v804_v16  ;;  %v1009_v16 = vld [vmem:[%s3675_s1 + $0x40] sm:$0xff] }
 0x10e   :  { %v1013_v19 = vld [vmem:[%s3675_s1 + $0x60] sm:$0xff] }
 0x114   :  { %v2560_v21 = vpop.eup %2559 }
 0x115   :  { %v2562_v28 = vpop.eup %2561  ;;  %v253_v29 = vmul.f32 %v2560_v21, %v2558_v20  ;;  %v813_v20 = vld [vmem:[%s3675_s1 + $0x1c8] sm:$0xff] }
 0x116   :  { %v252_v34 = vmul.f32 0.0, %v2562_v28  ;;  %v817_v21 = vld [vmem:[%s3675_s1 + $0x1e8] sm:$0xff] }
 0x117   :  { %v2564_v36 = vpop.eup %2563  ;;  %v3193_v28 = vpack.c.bf16 %v817_v21, %v813_v20  ;;  %v3285_v21 = vpack.c.bf16 %v1013_v19, %v1009_v16  ;;  %v1063_v16 = vld [vmem:[%s3675_s1 + $0x1f0] sm:$0xff] }
 0x118   :  { %v3035_v35 = vadd.f32 %v253_v29, %v252_v34  ;;  %v812_v29 = vld [vmem:[%s3675_s1 + $0x1c0] sm:$0xff] }
 0x119   :  { %v816_v34 = vld [vmem:[%s3675_s1 + $0x1e0] sm:$0xff] }
 0x11a   :  { %2565 = vtanh.f32 %v3035_v35 }
 0x124   :  { %v2566_v38 = vpop.eup %2565 }
 0x125   :  { %v256_v43 = vmul.f32 %v2566_v38, %v2564_v36  ;;  %v1990_v36 = vld [vmem:[%s3676_s0 + $0x40] sm:$0xff]  ;;  %v1991_v38 = vld [vmem:[%s3676_s0 + $0x48] sm:$0xff] }
 0x127   :  { %259 = vst [vmem:[%s3677_s2] sm:$0xff] %v256_v43  ;;  %395 = vmatmul.mubr.f32.vlgmr.msra.gmra.mrb[2].mxu0 %v256_v43  ;;  %466 = vmatmul.mubr.f32.vlgmr.msra.gmra.mrb[2].mxu1 %v256_v43 }
 0x128   :  { %2169 = vmatpush1.bf16.msra.mxu0 %v2717_v8  ;;  %2201 = vmatpush1.bf16.msra.mxu1 %v2766_v25 }
 0x129   :  { %2171 = vmatprep.subr.bf16.mxu0 %v2719_v9  ;;  %2203 = vmatprep.subr.bf16.mxu1 %v2791_v33 }
 0x12a   :  { %639 = vmatprep.mubr.f32.mxu0 %v2679_v3  ;;  %710 = vmatprep.mubr.f32.mxu1 %v2679_v3 }
 0x12c   :  { %2173 = vmatpush1.bf16.msra.mxu0 %v2735_v14  ;;  %2205 = vmatpush1.bf16.msra.mxu1 %v2802_v37 }
 0x12d   :  { %2175 = vmatprep.subr.bf16.mxu0 %v2744_v17  ;;  %2207 = vmatprep.subr.bf16.mxu1 %v2826_v45 }
 0x130   :  { %2177 = vmatpush1.bf16.msra.mxu0 %v2769_v26  ;;  %2209 = vmatpush1.bf16.msra.mxu1 %v2835_v48 }
 0x131   :  { %2179 = vmatprep.subr.bf16.mxu0 %v2782_v30  ;;  %2211 = vmatprep.subr.bf16.mxu1 %v2847_v52  ;;  %v1982_v30 = vld [vmem:[%s3676_s0 + $0x20] sm:$0xff] }
 0x134   :  { %2181 = vmatpush1.bf16.msra.mxu0 %v2818_v42  ;;  %2213 = vmatpush1.bf16.msra.mxu1 %v2877_v62  ;;  %v1983_v42 = vld [vmem:[%s3676_s0 + $0x28] sm:$0xff] }
 0x135   :  { %2183 = vmatprep.subr.bf16.mxu0 %v2829_v46  ;;  %2215 = vmatprep.subr.bf16.mxu1 %v2883_v0 }
 0x138   :  { %2185 = vmatpush1.bf16.msra.mxu0 %v2856_v55  ;;  %2217 = vmatpush1.bf16.msra.mxu1 %v2913_v15 }
 0x139   :  { %2187 = vmatprep.subr.bf16.mxu0 %v2865_v58  ;;  %2219 = vmatprep.subr.bf16.mxu1 %v2919_v18 }
 0x13c   :  { %2189 = vmatpush1.bf16.msra.mxu0 %v2898_v7  ;;  %2221 = vmatpush1.bf16.msra.mxu1 %v2946_v31 }
 0x13d   :  { %2191 = vmatprep.subr.bf16.mxu0 %v2901_v10  ;;  %2223 = vmatprep.subr.bf16.mxu1 %v2949_v32 }
 0x140   :  { %2193 = vmatpush1.bf16.msra.mxu0 %v2934_v24  ;;  %2225 = vmatpush1.bf16.msra.mxu1 %v2968_v40 }
 0x141   :  { %2195 = vmatprep.subr.bf16.mxu0 %v2937_v27  ;;  %2227 = vmatprep.subr.bf16.mxu1 %v2971_v41 }
 0x144   :  { %2197 = vmatpush1.bf16.msra.mxu0 %v2964_v39  ;;  %2229 = vmatpush1.bf16.msra.mxu1 %v2981_v47 }
 0x145   :  { %2231 = vmatprep.subr.bf16.mxu0 %v2706_v4  ;;  %2263 = vmatprep.subr.bf16.mxu1 %v2758_v22  ;;  %v1985_v4 = vld [vmem:[%s3676_s0 + $0x38] sm:$0xff] }
 0x1fa   :  { %v396_v46 = vpop.f32.mrb[2].mxu0  ;;  %v467_v55 = vpop.f32.mrb[2].mxu1 }
 0x1fb   :  { %v472_v58 = vadd.f32 %v1982_v30, %v396_v46  ;;  %v398_v7 = vpop.f32.mrb[3].mxu0  ;;  %v469_v10 = vpop.f32.mrb[3].mxu1  ;;  %v474_v50 = vadd.f32 %v1984_v44, %v467_v55 }
 0x1fc   :  { %v473_v24 = vadd.f32 %v1983_v42, %v398_v7  ;;  %v475_v22 = vadd.f32 %v1985_v4, %v469_v10 }
 0x1fd   :  { %v1986_v27 = vmul.f32 -1.442695, %v472_v58 }
 0x1fe   :  { %v1987_v39 = vmul.f32 -1.442695, %v473_v24  ;;  %v1988_v49 = vmul.f32 -1.442695, %v475_v22  ;;  %v1993_v24 = vld [vmem:[%s3676_s0 + $0x58] sm:$0xff] }
 0x1ff   :  { %2567 = vpow2.f32 %v1986_v27 }
 0x200   :  { %2569 = vpow2.f32 %v1987_v39  ;;  %v1992_v39 = vld [vmem:[%s3676_s0 + $0x50] sm:$0xff] }
 0x201   :  { %2571 = vpow2.f32 %v1988_v49 }
 0x202   :  { %2573 = vtanh.f32 %v474_v50 }
 0x209   :  { %v2568_v51 = vpop.eup %2567 }
 0x20a   :  { %v2570_v53 = vpop.eup %2569  ;;  %v479_v54 = vadd.f32 1.0, %v2568_v51 }
 0x20b   :  { %v485_v56 = vadd.f32 1.0, %v2570_v53  ;;  %v2572_v57 = vpop.eup %2571 }
 0x20c   :  { %2575 = vrcp.f32 %v479_v54  ;;  %v2574_v59 = vpop.eup %2573  ;;  %v492_v1 = vadd.f32 1.0, %v2572_v57 }
 0x20d   :  { %2577 = vrcp.f32 %v485_v56 }
 0x20e   :  { %2579 = vrcp.f32 %v492_v1 }
 0x216   :  { %v2576_v60 = vpop.eup %2575 }
 0x217   :  { %v2578_v61 = vpop.eup %2577  ;;  %v497_v63 = vmul.f32 %v2576_v60, %v2574_v59 }
 0x218   :  { %v496_v2 = vmul.f32 %v2578_v61, %v3035_v35  ;;  %v2580_v6 = vpop.eup %2579  ;;  %v3202_v35 = vpack.c.bf16 %v816_v34, %v812_v29  ;;  %v1011_v29 = vld [vmem:[%s3675_s1 + $0x50] sm:$0xff] }
 0x219   :  { %v1015_v34 = vld [vmem:[%s3675_s1 + $0x70] sm:$0xff] }
 0x21a   :  { %v3088_v5 = vadd.f32 %v497_v63, %v496_v2 }
 0x21c   :  { %2581 = vtanh.f32 %v3088_v5 }
 0x226   :  { %v2582_v11 = vpop.eup %2581 }
 0x227   :  { %v500_v12 = vmul.f32 %v2582_v11, %v2580_v6  ;;  %v1006_v11 = vld [vmem:[%s3675_s1 + $0x28] sm:$0xff] }
 0x229   :  { %1989 = vst [vmem:[%s3677_s2 + $0x8] sm:$0xff] %v500_v12  ;;  %640 = vmatmul.mubr.f32.vlgmr.msra.gmra.mrb[4].mxu0 %v500_v12  ;;  %711 = vmatmul.mubr.f32.vlgmr.msra.gmra.mrb[4].mxu1 %v500_v12  ;;  %v1004_v12 = vld [vmem:[%s3675_s1 + $0x18] sm:$0xff] }
 0x22a   :  { %2233 = vmatpush1.bf16.msra.mxu0 %v2717_v8  ;;  %2265 = vmatpush1.bf16.msra.mxu1 %v2766_v25  ;;  %v781_v8 = vld [vmem:[%s3675_s1 + $0xc8] sm:$0xff]  ;;  %v784_v25 = vld [vmem:[%s3675_s1 + $0xe0] sm:$0xff] }
 0x22b   :  { %2235 = vmatprep.subr.bf16.mxu0 %v2719_v9  ;;  %2267 = vmatprep.subr.bf16.mxu1 %v2791_v33  ;;  %v785_v9 = vld [vmem:[%s3675_s1 + $0xe8] sm:$0xff] }
 0x22c   :  { %884 = vmatprep.mubr.f32.mxu0 %v2679_v3  ;;  %955 = vmatprep.mubr.f32.mxu1 %v2679_v3  ;;  %v789_v33 = vld [vmem:[%s3675_s1 + $0x108] sm:$0xff] }
 0x22e   :  { %2237 = vmatpush1.bf16.msra.mxu0 %v2735_v14  ;;  %2269 = vmatpush1.bf16.msra.mxu1 %v2802_v37  ;;  %v3122_v14 = vpack.c.bf16 %v785_v9, %v781_v8  ;;  %v793_v37 = vld [vmem:[%s3675_s1 + $0x128] sm:$0xff]  ;;  %v1008_v9 = vld [vmem:[%s3675_s1 + $0x38] sm:$0xff] }
 0x22f   :  { %2239 = vmatprep.subr.bf16.mxu0 %v2744_v17  ;;  %2271 = vmatprep.subr.bf16.mxu1 %v2826_v45  ;;  %v780_v17 = vld [vmem:[%s3675_s1 + $0xc0] sm:$0xff]  ;;  %v3140_v45 = vpack.c.bf16 %v793_v37, %v789_v33  ;;  %v3247_v33 = vpack.c.bf16 %v1008_v9, %v1004_v12  ;;  %v1056_v12 = vld [vmem:[%s3675_s1 + $0x1b8] sm:$0xff] }
 0x232   :  { %2241 = vmatpush1.bf16.msra.mxu0 %v2769_v26  ;;  %2273 = vmatpush1.bf16.msra.mxu1 %v2835_v48  ;;  %v3130_v26 = vpack.c.bf16 %v784_v25, %v780_v17  ;;  %v788_v48 = vld [vmem:[%s3675_s1 + $0x100] sm:$0xff] }
 0x233   :  { %2275 = vmatprep.subr.bf16.mxu1 %v2847_v52  ;;  %2243 = vmatprep.subr.bf16.mxu0 %v3122_v14  ;;  %v792_v52 = vld [vmem:[%s3675_s1 + $0x120] sm:$0xff] }
 0x234   :  { %v1001_v17 = vld [vmem:[%s3675_s1] sm:$0xff] }
 0x235   :  { %v1005_v25 = vld [vmem:[%s3675_s1 + $0x20] sm:$0xff] }
 0x236   :  { %2277 = vmatpush1.bf16.msra.mxu1 %v2877_v62  ;;  %2245 = vmatpush1.bf16.msra.mxu0 %v3130_v26  ;;  %v3148_v62 = vpack.c.bf16 %v792_v52, %v788_v48  ;;  %v3249_v37 = vpack.c.bf16 %v1005_v25, %v1001_v17  ;;  %v1003_v48 = vld [vmem:[%s3675_s1 + $0x10] sm:$0xff] }
 0x237   :  { %2279 = vmatprep.subr.bf16.mxu1 %v2883_v0  ;;  %2247 = vmatprep.subr.bf16.mxu0 %v3140_v45  ;;  %v797_v0 = vld [vmem:[%s3675_s1 + $0x148] sm:$0xff]  ;;  %v1007_v52 = vld [vmem:[%s3675_s1 + $0x30] sm:$0xff] }
 0x238   :  { %v1051_v25 = vld [vmem:[%s3675_s1 + $0x190] sm:$0xff] }
 0x23a   :  { %2281 = vmatpush1.bf16.msra.mxu1 %v2913_v15  ;;  %v801_v15 = vld [vmem:[%s3675_s1 + $0x168] sm:$0xff]  ;;  %2249 = vmatpush1.bf16.msra.mxu0 %v3148_v62 }
 0x23b   :  { %2283 = vmatprep.subr.bf16.mxu1 %v2919_v18  ;;  %v796_v18 = vld [vmem:[%s3675_s1 + $0x140] sm:$0xff] }
 0x23e   :  { %2285 = vmatpush1.bf16.msra.mxu1 %v2946_v31  ;;  %v3161_v31 = vpack.c.bf16 %v801_v15, %v797_v0  ;;  %v3258_v0 = vpack.c.bf16 %v1007_v52, %v1003_v48  ;;  %v1010_v15 = vld [vmem:[%s3675_s1 + $0x48] sm:$0xff]  ;;  %v1055_v48 = vld [vmem:[%s3675_s1 + $0x1b0] sm:$0xff]  ;;  %v1060_v52 = vld [vmem:[%s3675_s1 + $0x1d8] sm:$0xff] }
 0x23f   :  { %2287 = vmatprep.subr.bf16.mxu1 %v2949_v32  ;;  %v800_v32 = vld [vmem:[%s3675_s1 + $0x160] sm:$0xff] }
 0x240   :  { %2251 = vmatprep.subr.bf16.mxu0 %v3161_v31 }
 0x242   :  { %2289 = vmatpush1.bf16.msra.mxu1 %v2968_v40  ;;  %v805_v40 = vld [vmem:[%s3675_s1 + $0x188] sm:$0xff] }
 0x243   :  { %2291 = vmatprep.subr.bf16.mxu1 %v2971_v41  ;;  %v809_v41 = vld [vmem:[%s3675_s1 + $0x1a8] sm:$0xff] }
 0x244   :  { %v3174_v13 = vpack.c.bf16 %v809_v41, %v805_v40  ;;  %v1016_v41 = vld [vmem:[%s3675_s1 + $0x78] sm:$0xff] }
 0x246   :  { %2293 = vmatpush1.bf16.msra.mxu1 %v2981_v47  ;;  %v3172_v47 = vpack.c.bf16 %v800_v32, %v796_v18  ;;  %v1014_v18 = vld [vmem:[%s3675_s1 + $0x68] sm:$0xff]  ;;  %v1012_v32 = vld [vmem:[%s3675_s1 + $0x58] sm:$0xff] }
 0x247   :  { %2327 = vmatprep.subr.bf16.mxu1 %v3247_v33  ;;  %v3272_v40 = vpack.c.bf16 %v1014_v18, %v1010_v15  ;;  %v3283_v20 = vpack.c.bf16 %v1016_v41, %v1012_v32  ;;  %v1064_v15 = vld [vmem:[%s3675_s1 + $0x1f8] sm:$0xff]  ;;  %v3416_v18 = vpack.c.bf16 %v1055_v48, %v1051_v25  ;;  %v1059_v41 = vld [vmem:[%s3675_s1 + $0x1d0] sm:$0xff] }
 0x248   :  { %2253 = vmatpush1.bf16.msra.mxu0 %v3172_v47  ;;  %v3419_v32 = vpack.c.bf16 %v1064_v15, %v1060_v52  ;;  %v3430_v19 = vpack.c.bf16 %v1063_v16, %v1059_v41 }
 0x249   :  { %2255 = vmatprep.subr.bf16.mxu0 %v3174_v13 }
 0x24c   :  { %2257 = vmatpush1.bf16.msra.mxu0 %v3190_v23 }
 0x24d   :  { %2259 = vmatprep.subr.bf16.mxu0 %v3193_v28 }
 0x250   :  { %2261 = vmatpush1.bf16.msra.mxu0 %v3202_v35 }
 0x2fc   :  { %v641_v43 = vpop.f32.mrb[4].mxu0  ;;  %v712_v30 = vpop.f32.mrb[4].mxu1 }
 0x2fd   :  { %v717_v42 = vadd.f32 %v1990_v36, %v641_v43  ;;  %v643_v46 = vpop.f32.mrb[5].mxu0  ;;  %v714_v55 = vpop.f32.mrb[5].mxu1  ;;  %v719_v22 = vadd.f32 %v1992_v39, %v712_v30  ;;  %v3294_v36 = vpack.c.bf16 %v1015_v34, %v1011_v29  ;;  %v1022_v43 = vld [vmem:[%s3675_s1 + $0xa8] sm:$0xff]  ;;  %v1020_v30 = vld [vmem:[%s3675_s1 + $0x98] sm:$0xff]  ;;  %v1998_v29 = vld [vmem:[%s3676_s0 + $0x60] sm:$0xff] }
 0x2fe   :  { %v718_v58 = vadd.f32 %v1991_v38, %v643_v46  ;;  %v720_v27 = vadd.f32 %v1993_v24, %v714_v55  ;;  %v1018_v38 = vld [vmem:[%s3675_s1 + $0x88] sm:$0xff]  ;;  %v1024_v46 = vld [vmem:[%s3675_s1 + $0xb8] sm:$0xff]  ;;  %v1017_v55 = vld [vmem:[%s3675_s1 + $0x80] sm:$0xff] }
 0x2ff   :  { %v1994_v7 = vmul.f32 -1.442695, %v717_v42  ;;  %v3308_v42 = vpack.c.bf16 %v1022_v43, %v1018_v38  ;;  %v1019_v24 = vld [vmem:[%s3675_s1 + $0x90] sm:$0xff]  ;;  %v1999_v34 = vld [vmem:[%s3676_s0 + $0x68] sm:$0xff] }
 0x300   :  { %v1995_v10 = vmul.f32 -1.442695, %v718_v58  ;;  %v1996_v4 = vmul.f32 -1.442695, %v720_v27  ;;  %v1021_v58 = vld [vmem:[%s3675_s1 + $0xa0] sm:$0xff]  ;;  %v1023_v27 = vld [vmem:[%s3675_s1 + $0xb0] sm:$0xff] }
 0x301   :  { %2583 = vpow2.f32 %v1994_v7  ;;  %v3319_v7 = vpack.c.bf16 %v1024_v46, %v1020_v30  ;;  %v3330_v39 = vpack.c.bf16 %v1023_v27, %v1019_v24 }
 0x302   :  { %2585 = vpow2.f32 %v1995_v10  ;;  %v3321_v10 = vpack.c.bf16 %v1021_v58, %v1017_v55 }
 0x303   :  { %2587 = vpow2.f32 %v1996_v4  ;;  %v1028_v4 = vld [vmem:[%s3675_s1 + $0xd8] sm:$0xff] }
 0x304   :  { %2589 = vtanh.f32 %v719_v22  ;;  %v1032_v22 = vld [vmem:[%s3675_s1 + $0xf8] sm:$0xff] }
 0x30b   :  { %v2584_v44 = vpop.eup %2583 }
 0x30c   :  { %v2586_v49 = vpop.eup %2585  ;;  %v724_v50 = vadd.f32 1.0, %v2584_v44  ;;  %v3342_v44 = vpack.c.bf16 %v1032_v22, %v1028_v4  ;;  %v2001_v4 = vld [vmem:[%s3676_s0 + $0x78] sm:$0xff] }
 0x30d   :  { %v730_v51 = vadd.f32 1.0, %v2586_v49  ;;  %v2588_v53 = vpop.eup %2587  ;;  %v1027_v49 = vld [vmem:[%s3675_s1 + $0xd0] sm:$0xff] }
 0x30e   :  { %2591 = vrcp.f32 %v724_v50  ;;  %v2590_v54 = vpop.eup %2589  ;;  %v737_v60 = vadd.f32 1.0, %v2588_v53  ;;  %v1031_v50 = vld [vmem:[%s3675_s1 + $0xf0] sm:$0xff]  ;;  %v1036_v53 = vld [vmem:[%s3675_s1 + $0x118] sm:$0xff] }
 0x30f   :  { %2593 = vrcp.f32 %v730_v51  ;;  %v3350_v51 = vpack.c.bf16 %v1031_v50, %v1027_v49  ;;  %v2000_v49 = vld [vmem:[%s3676_s0 + $0x70] sm:$0xff] }
 0x310   :  { %2595 = vrcp.f32 %v737_v60 }
 0x318   :  { %v2592_v56 = vpop.eup %2591 }
 0x319   :  { %v2594_v57 = vpop.eup %2593  ;;  %v742_v59 = vmul.f32 %v2592_v56, %v2590_v54  ;;  %v1040_v54 = vld [vmem:[%s3675_s1 + $0x138] sm:$0xff] }
 0x31a   :  { %v741_v61 = vmul.f32 %v2594_v57, %v3088_v5  ;;  %v2596_v1 = vpop.eup %2595  ;;  %v1002_v5 = vld [vmem:[%s3675_s1 + $0x8] sm:$0xff]  ;;  %v3362_v56 = vpack.c.bf16 %v1040_v54, %v1036_v53  ;;  %v1035_v57 = vld [vmem:[%s3675_s1 + $0x110] sm:$0xff] }
 0x31b   :  { %v3236_v8 = vpack.c.bf16 %v1006_v11, %v1002_v5  ;;  %v1047_v5 = vld [vmem:[%s3675_s1 + $0x170] sm:$0xff]  ;;  %v1052_v11 = vld [vmem:[%s3675_s1 + $0x198] sm:$0xff] }
 0x31c   :  { %v3219_v63 = vadd.f32 %v742_v59, %v741_v61  ;;  %v1039_v59 = vld [vmem:[%s3675_s1 + $0x130] sm:$0xff]  ;;  %v1044_v61 = vld [vmem:[%s3675_s1 + $0x158] sm:$0xff]  ;;  %v3399_v17 = vpack.c.bf16 %v1056_v12, %v1052_v11 }
 0x31d   :  { %2295 = vmatprep.subr.bf16.mxu0 %v3236_v8  ;;  %v3370_v60 = vpack.c.bf16 %v1039_v59, %v1035_v57 }
 0x31e   :  { %2597 = vtanh.f32 %v3219_v63 }
 0x328   :  { %v2598_v2 = vpop.eup %2597 }
 0x329   :  { %v745_v6 = vmul.f32 %v2598_v2, %v2596_v1  ;;  %v1048_v1 = vld [vmem:[%s3675_s1 + $0x178] sm:$0xff]  ;;  %v1043_v2 = vld [vmem:[%s3675_s1 + $0x150] sm:$0xff] }
 0x32a   :  { %v3396_v9 = vpack.c.bf16 %v1047_v5, %v1043_v2 }
 0x32b   :  { %1997 = vst [vmem:[%s3677_s2 + $0x10] sm:$0xff] %v745_v6  ;;  %885 = vmatmul.mubr.f32.vlgmr.msra.gmra.mrb[6].mxu0 %v745_v6  ;;  %956 = vmatmul.mubr.f32.vlgmr.msra.gmra.mrb[6].mxu1 %v745_v6  ;;  %v3383_v6 = vpack.c.bf16 %v1048_v1, %v1044_v61 }
 0x32c   :  { %1129 = vmatprep.mubr.f32.mxu0 %v2679_v3  ;;  %1200 = vmatprep.mubr.f32.mxu1 %v2679_v3 }
 0x32d   :  { %2297 = vmatpush1.bf16.msra.mxu0 %v3249_v37  ;;  %2329 = vmatpush1.bf16.msra.mxu1 %v3258_v0 }
 0x32e   :  { %2299 = vmatprep.subr.bf16.mxu0 %v3272_v40  ;;  %2331 = vmatprep.subr.bf16.mxu1 %v3283_v20 }
 0x331   :  { %2301 = vmatpush1.bf16.msra.mxu0 %v3285_v21  ;;  %2333 = vmatpush1.bf16.msra.mxu1 %v3294_v36 }
 0x332   :  { %2303 = vmatprep.subr.bf16.mxu0 %v3308_v42  ;;  %2335 = vmatprep.subr.bf16.mxu1 %v3319_v7 }
 0x335   :  { %2305 = vmatpush1.bf16.msra.mxu0 %v3321_v10  ;;  %2337 = vmatpush1.bf16.msra.mxu1 %v3330_v39 }
 0x336   :  { %2307 = vmatprep.subr.bf16.mxu0 %v3122_v14  ;;  %2339 = vmatprep.subr.bf16.mxu1 %v3342_v44 }
 0x339   :  { %2309 = vmatpush1.bf16.msra.mxu0 %v3130_v26  ;;  %2341 = vmatpush1.bf16.msra.mxu1 %v3350_v51 }
 0x33a   :  { %2311 = vmatprep.subr.bf16.mxu0 %v3140_v45  ;;  %2343 = vmatprep.subr.bf16.mxu1 %v3362_v56 }
 0x33d   :  { %2313 = vmatpush1.bf16.msra.mxu0 %v3148_v62  ;;  %2345 = vmatpush1.bf16.msra.mxu1 %v3370_v60 }
 0x33e   :  { %2315 = vmatprep.subr.bf16.mxu0 %v3161_v31  ;;  %2347 = vmatprep.subr.bf16.mxu1 %v3383_v6 }
 0x341   :  { %2317 = vmatpush1.bf16.msra.mxu0 %v3172_v47  ;;  %2349 = vmatpush1.bf16.msra.mxu1 %v3396_v9 }
 0x342   :  { %2319 = vmatprep.subr.bf16.mxu0 %v3174_v13  ;;  %2351 = vmatprep.subr.bf16.mxu1 %v3399_v17 }
 0x345   :  { %2321 = vmatpush1.bf16.msra.mxu0 %v3190_v23  ;;  %2353 = vmatpush1.bf16.msra.mxu1 %v3416_v18 }
 0x346   :  { %2323 = vmatprep.subr.bf16.mxu0 %v3193_v28  ;;  %2355 = vmatprep.subr.bf16.mxu1 %v3419_v32 }
 0x349   :  { %2325 = vmatpush1.bf16.msra.mxu0 %v3202_v35  ;;  %2357 = vmatpush1.bf16.msra.mxu1 %v3430_v19 }
 0x34a   :  { %2359 = vmatprep.subr.bf16.mxu0 %v3236_v8  ;;  %2391 = vmatprep.subr.bf16.mxu1 %v3247_v33 }
 0x3fe   :  { %v886_v38 = vpop.f32.mrb[6].mxu0  ;;  %v957_v43 = vpop.f32.mrb[6].mxu1 }
 0x3ff   :  { %v962_v30 = vadd.f32 %v1998_v29, %v886_v38  ;;  %v888_v46 = vpop.f32.mrb[7].mxu0  ;;  %v959_v55 = vpop.f32.mrb[7].mxu1  ;;  %v964_v53 = vadd.f32 %v2000_v49, %v957_v43  ;;  %v2007_v29 = vld [vmem:[%s3676_s0 + $0x88] sm:$0xff] }
 0x400   :  { %v963_v58 = vadd.f32 %v1999_v34, %v888_v46  ;;  %v965_v22 = vadd.f32 %v2001_v4, %v959_v55 }
 0x401   :  { %v2002_v24 = vmul.f32 -1.442695, %v962_v30 }
 0x402   :  { %v2003_v27 = vmul.f32 -1.442695, %v963_v58  ;;  %v2004_v50 = vmul.f32 -1.442695, %v965_v22  ;;  %v2008_v22 = vld [vmem:[%s3676_s0 + $0x90] sm:$0xff] }
 0x403   :  { %2599 = vpow2.f32 %v2002_v24 }
 0x404   :  { %2601 = vpow2.f32 %v2003_v27  ;;  %v2009_v27 = vld [vmem:[%s3676_s0 + $0x98] sm:$0xff] }
 0x405   :  { %2603 = vpow2.f32 %v2004_v50 }
 0x406   :  { %2605 = vtanh.f32 %v964_v53 }
 0x40d   :  { %v2600_v54 = vpop.eup %2599 }
 0x40e   :  { %v2602_v57 = vpop.eup %2601  ;;  %v969_v59 = vadd.f32 1.0, %v2600_v54 }
 0x40f   :  { %v975_v61 = vadd.f32 1.0, %v2602_v57  ;;  %v2604_v1 = vpop.eup %2603 }
 0x410   :  { %2607 = vrcp.f32 %v969_v59  ;;  %v2606_v2 = vpop.eup %2605  ;;  %v982_v25 = vadd.f32 1.0, %v2604_v1 }
 0x411   :  { %2609 = vrcp.f32 %v975_v61 }
 0x412   :  { %2611 = vrcp.f32 %v982_v25 }
 0x41a   :  { %v2608_v5 = vpop.eup %2607 }
 0x41b   :  { %v2610_v11 = vpop.eup %2609  ;;  %v987_v12 = vmul.f32 %v2608_v5, %v2606_v2 }
 0x41c   :  { %v986_v48 = vmul.f32 %v2610_v11, %v3219_v63  ;;  %v2612_v15 = vpop.eup %2611  ;;  %v2006_v63 = vld [vmem:[%s3676_s0 + $0x80] sm:$0xff] }
 0x41e   :  { %v3450_v52 = vadd.f32 %v987_v12, %v986_v48 }
 0x420   :  { %2613 = vtanh.f32 %v3450_v52 }
 0x42a   :  { %v2614_v41 = vpop.eup %2613 }
 0x42b   :  { %v990_v16 = vmul.f32 %v2614_v41, %v2612_v15 }
 0x42d   :  { %2005 = vst [vmem:[%s3677_s2 + $0x18] sm:$0xff] %v990_v16  ;;  %1130 = vmatmul.mubr.f32.vlgmr.msra.gmra.mrb[8].mxu0 %v990_v16  ;;  %1201 = vmatmul.mubr.f32.vlgmr.msra.gmra.mrb[8].mxu1 %v990_v16 }
 0x42e   :  { %2361 = vmatpush1.bf16.msra.mxu0 %v3249_v37  ;;  %2393 = vmatpush1.bf16.msra.mxu1 %v3258_v0 }
 0x42f   :  { %2363 = vmatprep.subr.bf16.mxu0 %v3272_v40  ;;  %2395 = vmatprep.subr.bf16.mxu1 %v3283_v20 }
 0x430   :  { %1374 = vmatprep.mubr.f32.mxu0 %v2679_v3  ;;  %1445 = vmatprep.mubr.f32.mxu1 %v2679_v3 }
 0x432   :  { %2365 = vmatpush1.bf16.msra.mxu0 %v3285_v21  ;;  %2397 = vmatpush1.bf16.msra.mxu1 %v3294_v36 }
 0x433   :  { %2367 = vmatprep.subr.bf16.mxu0 %v3308_v42  ;;  %2399 = vmatprep.subr.bf16.mxu1 %v3319_v7 }
 0x436   :  { %2369 = vmatpush1.bf16.msra.mxu0 %v3321_v10  ;;  %2401 = vmatpush1.bf16.msra.mxu1 %v3330_v39 }
 0x437   :  { %2371 = vmatprep.subr.bf16.mxu0 %v3122_v14  ;;  %2403 = vmatprep.subr.bf16.mxu1 %v3342_v44 }
 0x43a   :  { %2373 = vmatpush1.bf16.msra.mxu0 %v3130_v26  ;;  %2405 = vmatpush1.bf16.msra.mxu1 %v3350_v51 }
 0x43b   :  { %2375 = vmatprep.subr.bf16.mxu0 %v3140_v45  ;;  %2407 = vmatprep.subr.bf16.mxu1 %v3362_v56 }
 0x43e   :  { %2377 = vmatpush1.bf16.msra.mxu0 %v3148_v62  ;;  %2409 = vmatpush1.bf16.msra.mxu1 %v3370_v60 }
 0x43f   :  { %2379 = vmatprep.subr.bf16.mxu0 %v3161_v31  ;;  %2411 = vmatprep.subr.bf16.mxu1 %v3383_v6 }
 0x442   :  { %2381 = vmatpush1.bf16.msra.mxu0 %v3172_v47  ;;  %2413 = vmatpush1.bf16.msra.mxu1 %v3396_v9 }
 0x443   :  { %2383 = vmatprep.subr.bf16.mxu0 %v3174_v13  ;;  %2415 = vmatprep.subr.bf16.mxu1 %v3399_v17 }
 0x446   :  { %2385 = vmatpush1.bf16.msra.mxu0 %v3190_v23  ;;  %2417 = vmatpush1.bf16.msra.mxu1 %v3416_v18 }
 0x447   :  { %2387 = vmatprep.subr.bf16.mxu0 %v3193_v28  ;;  %2419 = vmatprep.subr.bf16.mxu1 %v3419_v32 }
 0x44a   :  { %2389 = vmatpush1.bf16.msra.mxu0 %v3202_v35  ;;  %2421 = vmatpush1.bf16.msra.mxu1 %v3430_v19 }
 0x44b   :  { %2423 = vmatprep.subr.bf16.mxu0 %v3236_v8  ;;  %2455 = vmatprep.subr.bf16.mxu1 %v3247_v33 }
 0x500   :  { %v1131_v34 = vpop.f32.mrb[8].mxu0  ;;  %v1202_v38 = vpop.f32.mrb[8].mxu1 }
 0x501   :  { %v1207_v43 = vadd.f32 %v2006_v63, %v1131_v34  ;;  %v1133_v30 = vpop.f32.mrb[9].mxu0  ;;  %v1204_v46 = vpop.f32.mrb[9].mxu1  ;;  %v1209_v50 = vadd.f32 %v2008_v22, %v1202_v38 }
 0x502   :  { %v1208_v55 = vadd.f32 %v2007_v29, %v1133_v30  ;;  %v1210_v4 = vadd.f32 %v2009_v27, %v1204_v46 }
 0x503   :  { %v2010_v58 = vmul.f32 -1.442695, %v1207_v43 }
 0x504   :  { %v2011_v24 = vmul.f32 -1.442695, %v1208_v55  ;;  %v2012_v49 = vmul.f32 -1.442695, %v1210_v4 }
 0x505   :  { %2615 = vpow2.f32 %v2010_v58 }
 0x506   :  { %2617 = vpow2.f32 %v2011_v24 }
 0x507   :  { %2619 = vpow2.f32 %v2012_v49 }
 0x508   :  { %2621 = vtanh.f32 %v1209_v50 }
 0x50f   :  { %v2616_v53 = vpop.eup %2615 }
 0x510   :  { %v2618_v54 = vpop.eup %2617  ;;  %v1214_v57 = vadd.f32 1.0, %v2616_v53 }
 0x511   :  { %v1220_v59 = vadd.f32 1.0, %v2618_v54  ;;  %v2620_v61 = vpop.eup %2619 }
 0x512   :  { %2623 = vrcp.f32 %v1214_v57  ;;  %v2622_v1 = vpop.eup %2621  ;;  %v1227_v12 = vadd.f32 1.0, %v2620_v61  ;;  %v1784_v57 = vld [vmem:[%s3675_s1 + $0x180] sm:$0xff]  ;;  %v1793_v61 = vld [vmem:[%s3675_s1 + $0x1c8] sm:$0xff] }
 0x513   :  { %2625 = vrcp.f32 %v1220_v59  ;;  %v1788_v59 = vld [vmem:[%s3675_s1 + $0x1a0] sm:$0xff] }
 0x514   :  { %2627 = vrcp.f32 %v1227_v12  ;;  %v1796_v12 = vld [vmem:[%s3675_s1 + $0x1e0] sm:$0xff] }
 0x51c   :  { %v2624_v2 = vpop.eup %2623 }
 0x51d   :  { %v2626_v5 = vpop.eup %2625  ;;  %v1232_v11 = vmul.f32 %v2624_v2, %v2622_v1  ;;  %v1797_v1 = vld [vmem:[%s3675_s1 + $0x1e8] sm:$0xff]  ;;  %v2512_v2 = vpack.c.bf16 %v1788_v59, %v1784_v57 }
 0x51e   :  { %v1231_v25 = vmul.f32 %v2626_v5, %v3450_v52  ;;  %v2628_v15 = vpop.eup %2627  ;;  %v2016_v52 = vld [vmem:[%s3676_s0 + $0xb0] sm:$0xff]  ;;  %v2514_v5 = vpack.c.bf16 %v1797_v1, %v1793_v61 }
 0x520   :  { %v3503_v48 = vadd.f32 %v1232_v11, %v1231_v25  ;;  %v1792_v11 = vld [vmem:[%s3675_s1 + $0x1c0] sm:$0xff] }
 0x521   :  { %v2516_v25 = vpack.c.bf16 %v1796_v12, %v1792_v11 }
 0x522   :  { %2629 = vtanh.f32 %v3503_v48 }
 0x52c   :  { %v2630_v41 = vpop.eup %2629 }
 0x52d   :  { %v1235_v16 = vmul.f32 %v2630_v41, %v2628_v15  ;;  %v2023_v15 = vld [vmem:[%s3676_s0 + $0xc8] sm:$0xff] }
 0x52f   :  { %2013 = vst [vmem:[%s3677_s2 + $0x20] sm:$0xff] %v1235_v16  ;;  %1375 = vmatmul.mubr.f32.vlgmr.msra.gmra.mrb[10].mxu0 %v1235_v16  ;;  %1446 = vmatmul.mubr.f32.vlgmr.msra.gmra.mrb[10].mxu1 %v1235_v16 }
 0x530   :  { %2425 = vmatpush1.bf16.msra.mxu0 %v3249_v37  ;;  %2457 = vmatpush1.bf16.msra.mxu1 %v3258_v0 }
 0x531   :  { %2427 = vmatprep.subr.bf16.mxu0 %v3272_v40  ;;  %2459 = vmatprep.subr.bf16.mxu1 %v3283_v20 }
 0x532   :  { %1619 = vmatprep.mubr.f32.mxu0 %v2679_v3  ;;  %1690 = vmatprep.mubr.f32.mxu1 %v2679_v3 }
 0x534   :  { %2429 = vmatpush1.bf16.msra.mxu0 %v3285_v21  ;;  %2461 = vmatpush1.bf16.msra.mxu1 %v3294_v36 }
 0x535   :  { %2431 = vmatprep.subr.bf16.mxu0 %v3308_v42  ;;  %2463 = vmatprep.subr.bf16.mxu1 %v3319_v7 }
 0x538   :  { %2433 = vmatpush1.bf16.msra.mxu0 %v3321_v10  ;;  %2465 = vmatpush1.bf16.msra.mxu1 %v3330_v39 }
 0x539   :  { %2435 = vmatprep.subr.bf16.mxu0 %v3122_v14  ;;  %2467 = vmatprep.subr.bf16.mxu1 %v3342_v44  ;;  %v2014_v14 = vld [vmem:[%s3676_s0 + $0xa0] sm:$0xff] }
 0x53c   :  { %2437 = vmatpush1.bf16.msra.mxu0 %v3130_v26  ;;  %2469 = vmatpush1.bf16.msra.mxu1 %v3350_v51  ;;  %v2015_v26 = vld [vmem:[%s3676_s0 + $0xa8] sm:$0xff] }
 0x53d   :  { %2439 = vmatprep.subr.bf16.mxu0 %v3140_v45  ;;  %2471 = vmatprep.subr.bf16.mxu1 %v3362_v56 }
 0x540   :  { %2441 = vmatpush1.bf16.msra.mxu0 %v3148_v62  ;;  %2473 = vmatpush1.bf16.msra.mxu1 %v3370_v60 }
 0x541   :  { %2443 = vmatprep.subr.bf16.mxu0 %v3161_v31  ;;  %2475 = vmatprep.subr.bf16.mxu1 %v3383_v6 }
 0x544   :  { %2445 = vmatpush1.bf16.msra.mxu0 %v3172_v47  ;;  %2477 = vmatpush1.bf16.msra.mxu1 %v3396_v9 }
 0x545   :  { %2447 = vmatprep.subr.bf16.mxu0 %v3174_v13  ;;  %2479 = vmatprep.subr.bf16.mxu1 %v3399_v17 }
 0x548   :  { %2449 = vmatpush1.bf16.msra.mxu0 %v3190_v23  ;;  %2481 = vmatpush1.bf16.msra.mxu1 %v3416_v18 }
 0x549   :  { %2451 = vmatprep.subr.bf16.mxu0 %v3193_v28  ;;  %2483 = vmatprep.subr.bf16.mxu1 %v3419_v32 }
 0x54c   :  { %2453 = vmatpush1.bf16.msra.mxu0 %v3202_v35  ;;  %2485 = vmatpush1.bf16.msra.mxu1 %v3430_v19 }
 0x54d   :  { %2487 = vmatprep.subr.bf16.mxu0 %v3236_v8  ;;  %2519 = vmatprep.subr.bf16.mxu1 %v3247_v33  ;;  %v2017_v8 = vld [vmem:[%s3676_s0 + $0xb8] sm:$0xff] }
 0x602   :  { %v1376_v45 = vpop.f32.mrb[10].mxu0  ;;  %v1447_v62 = vpop.f32.mrb[10].mxu1 }
 0x603   :  { %v1452_v31 = vadd.f32 %v2014_v14, %v1376_v45  ;;  %v1378_v47 = vpop.f32.mrb[11].mxu0  ;;  %v1449_v13 = vpop.f32.mrb[11].mxu1  ;;  %v1454_v29 = vadd.f32 %v2016_v52, %v1447_v62 }
 0x604   :  { %v1453_v23 = vadd.f32 %v2015_v26, %v1378_v47  ;;  %v1455_v33 = vadd.f32 %v2017_v8, %v1449_v13  ;;  %v2025_v13 = vld [vmem:[%s3676_s0 + $0xd8] sm:$0xff] }
 0x605   :  { %v2018_v28 = vmul.f32 -1.442695, %v1452_v31 }
 0x606   :  { %v2019_v35 = vmul.f32 -1.442695, %v1453_v23  ;;  %v2020_v63 = vmul.f32 -1.442695, %v1455_v33 }
 0x607   :  { %2631 = vpow2.f32 %v2018_v28  ;;  %v2024_v28 = vld [vmem:[%s3676_s0 + $0xd0] sm:$0xff] }
 0x608   :  { %2633 = vpow2.f32 %v2019_v35 }
 0x609   :  { %2635 = vpow2.f32 %v2020_v63 }
 0x60a   :  { %2637 = vtanh.f32 %v1454_v29 }
 0x611   :  { %v2632_v34 = vpop.eup %2631 }
 0x612   :  { %v2634_v38 = vpop.eup %2633  ;;  %v1459_v43 = vadd.f32 1.0, %v2632_v34 }
 0x613   :  { %v1465_v30 = vadd.f32 1.0, %v2634_v38  ;;  %v2636_v46 = vpop.eup %2635 }
 0x614   :  { %2639 = vrcp.f32 %v1459_v43  ;;  %v2638_v55 = vpop.eup %2637  ;;  %v1472_v4 = vadd.f32 1.0, %v2636_v46 }
 0x615   :  { %2641 = vrcp.f32 %v1465_v30 }
 0x616   :  { %2643 = vrcp.f32 %v1472_v4 }
 0x61e   :  { %v2640_v58 = vpop.eup %2639 }
 0x61f   :  { %v2642_v24 = vpop.eup %2641  ;;  %v1477_v27 = vmul.f32 %v2640_v58, %v2638_v55 }
 0x620   :  { %v1476_v22 = vmul.f32 %v2642_v24, %v3503_v48  ;;  %v2644_v50 = vpop.eup %2643  ;;  %v2022_v48 = vld [vmem:[%s3676_s0 + $0xc0] sm:$0xff] }
 0x622   :  { %v3556_v49 = vadd.f32 %v1477_v27, %v1476_v22 }
 0x624   :  { %2645 = vtanh.f32 %v3556_v49 }
 0x62e   :  { %v2646_v53 = vpop.eup %2645 }
 0x62f   :  { %v1480_v54 = vmul.f32 %v2646_v53, %v2644_v50  ;;  %v2030_v50 = vld [vmem:[%s3676_s0 + $0xe0] sm:$0xff] }
 0x631   :  { %2021 = vst [vmem:[%s3677_s2 + $0x28] sm:$0xff] %v1480_v54  ;;  %1620 = vmatmul.mubr.f32.vlgmr.msra.gmra.mrb[12].mxu0 %v1480_v54  ;;  %1691 = vmatmul.mubr.f32.vlgmr.msra.gmra.mrb[12].mxu1 %v1480_v54 }
 0x632   :  { %2489 = vmatpush1.bf16.msra.mxu0 %v3249_v37  ;;  %2521 = vmatpush1.bf16.msra.mxu1 %v3258_v0  ;;  %v1765_v37 = vld [vmem:[%s3675_s1 + $0xe8] sm:$0xff] }
 0x633   :  { %2491 = vmatprep.subr.bf16.mxu0 %v3272_v40  ;;  %2523 = vmatprep.subr.bf16.mxu1 %v3283_v20  ;;  %v1760_v40 = vld [vmem:[%s3675_s1 + $0xc0] sm:$0xff] }
 0x634   :  { %1864 = vmatprep.mubr.f32.mxu0 %v2679_v3  ;;  %1935 = vmatprep.mubr.f32.mxu1 %v2679_v3  ;;  %v1761_v3 = vld [vmem:[%s3675_s1 + $0xc8] sm:$0xff]  ;;  %v1764_v20 = vld [vmem:[%s3675_s1 + $0xe0] sm:$0xff] }
 0x635   :  { %v2498_v0 = vpack.c.bf16 %v1765_v37, %v1761_v3 }
 0x636   :  { %2493 = vmatpush1.bf16.msra.mxu0 %v3285_v21  ;;  %2525 = vmatpush1.bf16.msra.mxu1 %v3294_v36  ;;  %v2500_v21 = vpack.c.bf16 %v1764_v20, %v1760_v40  ;;  %v1769_v36 = vld [vmem:[%s3675_s1 + $0x108] sm:$0xff] }
 0x637   :  { %2495 = vmatprep.subr.bf16.mxu0 %v3308_v42  ;;  %2527 = vmatprep.subr.bf16.mxu1 %v3319_v7  ;;  %v1773_v42 = vld [vmem:[%s3675_s1 + $0x128] sm:$0xff] }
 0x638   :  { %v2502_v7 = vpack.c.bf16 %v1773_v42, %v1769_v36  ;;  %v2033_v36 = vld [vmem:[%s3676_s0 + $0xf8] sm:$0xff] }
 0x63a   :  { %2497 = vmatpush1.bf16.msra.mxu0 %v3321_v10  ;;  %2529 = vmatpush1.bf16.msra.mxu1 %v3330_v39  ;;  %v1768_v10 = vld [vmem:[%s3675_s1 + $0x100] sm:$0xff] }
 0x63b   :  { %2531 = vmatprep.subr.bf16.mxu1 %v3342_v44  ;;  %2499 = vmatprep.subr.bf16.mxu0 %v2498_v0  ;;  %v1772_v39 = vld [vmem:[%s3675_s1 + $0x120] sm:$0xff] }
 0x63c   :  { %v2504_v44 = vpack.c.bf16 %v1772_v39, %v1768_v10 }
 0x63e   :  { %2533 = vmatpush1.bf16.msra.mxu1 %v3350_v51  ;;  %2501 = vmatpush1.bf16.msra.mxu0 %v2500_v21  ;;  %v1777_v51 = vld [vmem:[%s3675_s1 + $0x148] sm:$0xff] }
 0x63f   :  { %2535 = vmatprep.subr.bf16.mxu1 %v3362_v56  ;;  %2503 = vmatprep.subr.bf16.mxu0 %v2502_v7  ;;  %v1781_v56 = vld [vmem:[%s3675_s1 + $0x168] sm:$0xff]  ;;  %v2032_v7 = vld [vmem:[%s3676_s0 + $0xf0] sm:$0xff] }
 0x642   :  { %2537 = vmatpush1.bf16.msra.mxu1 %v3370_v60  ;;  %v1776_v60 = vld [vmem:[%s3675_s1 + $0x140] sm:$0xff]  ;;  %2505 = vmatpush1.bf16.msra.mxu0 %v2504_v44 }
 0x643   :  { %2539 = vmatprep.subr.bf16.mxu1 %v3383_v6  ;;  %v2506_v6 = vpack.c.bf16 %v1781_v56, %v1777_v51 }
 0x645   :  { %2507 = vmatprep.subr.bf16.mxu0 %v2506_v6 }
 0x646   :  { %2541 = vmatpush1.bf16.msra.mxu1 %v3396_v9  ;;  %v1780_v9 = vld [vmem:[%s3675_s1 + $0x160] sm:$0xff] }
 0x647   :  { %2543 = vmatprep.subr.bf16.mxu1 %v3399_v17  ;;  %v1785_v17 = vld [vmem:[%s3675_s1 + $0x188] sm:$0xff] }
 0x64a   :  { %2545 = vmatpush1.bf16.msra.mxu1 %v3416_v18  ;;  %v1789_v18 = vld [vmem:[%s3675_s1 + $0x1a8] sm:$0xff] }
 0x64b   :  { %2547 = vmatprep.subr.bf16.mxu1 %v3419_v32  ;;  %v2508_v32 = vpack.c.bf16 %v1780_v9, %v1776_v60 }
 0x64d   :  { %2509 = vmatpush1.bf16.msra.mxu0 %v2508_v32 }
 0x64e   :  { %2549 = vmatpush1.bf16.msra.mxu1 %v3430_v19  ;;  %v2510_v19 = vpack.c.bf16 %v1789_v18, %v1785_v17 }
 0x650   :  { %2511 = vmatprep.subr.bf16.mxu0 %v2510_v19 }
 0x651   :  { %2513 = vmatpush1.bf16.msra.mxu0 %v2512_v2 }
 0x652   :  { %2515 = vmatprep.subr.bf16.mxu0 %v2514_v5 }
 0x655   :  { %2517 = vmatpush1.bf16.msra.mxu0 %v2516_v25 }
 0x704   :  { %v1621_v41 = vpop.f32.mrb[12].mxu0  ;;  %v1692_v16 = vpop.f32.mrb[12].mxu1 }
 0x705   :  { %v1697_v14 = vadd.f32 %v2022_v48, %v1621_v41  ;;  %v1623_v26 = vpop.f32.mrb[13].mxu0  ;;  %v1694_v45 = vpop.f32.mrb[13].mxu1  ;;  %v1699_v8 = vadd.f32 %v2024_v28, %v1692_v16 }
 0x706   :  { %v1698_v62 = vadd.f32 %v2023_v15, %v1623_v26  ;;  %v1700_v23 = vadd.f32 %v2025_v13, %v1694_v45 }
 0x707   :  { %v2026_v31 = vmul.f32 -1.442695, %v1697_v14 }
 0x708   :  { %v2027_v47 = vmul.f32 -1.442695, %v1698_v62  ;;  %v2028_v35 = vmul.f32 -1.442695, %v1700_v23 }
 0x709   :  { %2647 = vpow2.f32 %v2026_v31 }
 0x70a   :  { %2649 = vpow2.f32 %v2027_v47 }
 0x70b   :  { %2651 = vpow2.f32 %v2028_v35 }
 0x70c   :  { %2653 = vtanh.f32 %v1699_v8 }
 0x713   :  { %v2648_v33 = vpop.eup %2647 }
 0x714   :  { %v2650_v52 = vpop.eup %2649  ;;  %v1704_v63 = vadd.f32 1.0, %v2648_v33 }
 0x715   :  { %v1710_v29 = vadd.f32 1.0, %v2650_v52  ;;  %v2652_v34 = vpop.eup %2651 }
 0x716   :  { %2655 = vrcp.f32 %v1704_v63  ;;  %v2654_v38 = vpop.eup %2653  ;;  %v1717_v55 = vadd.f32 1.0, %v2652_v34 }
 0x717   :  { %2657 = vrcp.f32 %v1710_v29 }
 0x718   :  { %2659 = vrcp.f32 %v1717_v55 }
 0x720   :  { %v2656_v43 = vpop.eup %2655 }
 0x721   :  { %v2658_v30 = vpop.eup %2657  ;;  %v1722_v46 = vmul.f32 %v2656_v43, %v2654_v38 }
 0x722   :  { %v1721_v58 = vmul.f32 %v2658_v30, %v3556_v49  ;;  %v2660_v27 = vpop.eup %2659  ;;  %v2031_v49 = vld [vmem:[%s3676_s0 + $0xe8] sm:$0xff] }
 0x724   :  { %v1723_v24 = vadd.f32 %v1722_v46, %v1721_v58 }
 0x726   :  { %2661 = vtanh.f32 %v1723_v24 }
 0x730   :  { %v2662_v4 = vpop.eup %2661 }
 0x731   :  { %v1725_v22 = vmul.f32 %v2662_v4, %v2660_v27 }
 0x733   :  { %2029 = vst [vmem:[%s3677_s2 + $0x30] sm:$0xff] %v1725_v22  ;;  %1865 = vmatmul.mubr.f32.vlgmr.msra.gmra.mrb[14].mxu0 %v1725_v22  ;;  %1936 = vmatmul.mubr.f32.vlgmr.msra.gmra.mrb[14].mxu1 %v1725_v22 }
 0x806   :  { %v1866_v53 = vpop.f32.mrb[14].mxu0  ;;  %v1937_v54 = vpop.f32.mrb[14].mxu1 }
 0x807   :  { %v1942_v3 = vadd.f32 %v2030_v50, %v1866_v53  ;;  %v1868_v37 = vpop.f32.mrb[15].mxu0  ;;  %v1939_v0 = vpop.f32.mrb[15].mxu1  ;;  %v1944_v39 = vadd.f32 %v2032_v7, %v1937_v54 }
 0x808   :  { %v1943_v40 = vadd.f32 %v2031_v49, %v1868_v37  ;;  %v1945_v42 = vadd.f32 %v2033_v36, %v1939_v0 }
 0x809   :  { %v2034_v20 = vmul.f32 -1.442695, %v1942_v3 }
 0x80a   :  { %v2035_v21 = vmul.f32 -1.442695, %v1943_v40  ;;  %v2036_v10 = vmul.f32 -1.442695, %v1945_v42 }
 0x80b   :  { %2663 = vpow2.f32 %v2034_v20 }
 0x80c   :  { %2665 = vpow2.f32 %v2035_v21 }
 0x80d   :  { %2667 = vpow2.f32 %v2036_v10 }
 0x80e   :  { %2669 = vtanh.f32 %v1944_v39 }
 0x815   :  { %v2664_v44 = vpop.eup %2663 }
 0x816   :  { %v2666_v51 = vpop.eup %2665  ;;  %v1949_v56 = vadd.f32 1.0, %v2664_v44 }
 0x817   :  { %v1955_v60 = vadd.f32 1.0, %v2666_v51  ;;  %v2668_v6 = vpop.eup %2667 }
 0x818   :  { %2671 = vrcp.f32 %v1949_v56  ;;  %v2670_v9 = vpop.eup %2669  ;;  %v1962_v19 = vadd.f32 1.0, %v2668_v6 }
 0x819   :  { %2673 = vrcp.f32 %v1955_v60 }
 0x81a   :  { %2675 = vrcp.f32 %v1962_v19 }
 0x822   :  { %v2672_v17 = vpop.eup %2671 }
 0x823   :  { %v2674_v18 = vpop.eup %2673  ;;  %v1967_v32 = vmul.f32 %v2672_v17, %v2670_v9 }
 0x824   :  { %v1966_v57 = vmul.f32 %v2674_v18, %v1723_v24  ;;  %v2676_v61 = vpop.eup %2675 }
 0x826   :  { %v1968_v59 = vadd.f32 %v1967_v32, %v1966_v57 }
 0x828   :  { %2677 = vtanh.f32 %v1968_v59 }
 0x832   :  { %v2678_v1 = vpop.eup %2677 }
 0x833   :  { %v1970_v2 = vmul.f32 %v2678_v1, %v2676_v61 }
 0x835   :  { %2037 = vst [vmem:[%s3677_s2 + $0x38] sm:$0xff] %v1970_v2 }

</bundles_post_ra>
